<compile_context>
chip_gen: v6e
topology: v6e:2x2x1
jax: 0.10.0
libtpu: 0.0.40
codegen_flags: <defaults>
</compile_context>

<pallas_src>
import functools

import jax
import jax.numpy as jnp
from jax import lax
from jax.experimental import pallas as pl
from jax.experimental.pallas import tpu as pltpu


def _round_up(x, m):
    return ((x + m - 1) // m) * m


def _vmem_limit_bytes():
    # ~85% of physical VMEM: leaves compiler headroom on every chip generation.
    try:
        cap = int(pltpu.get_tpu_info().vmem_capacity_bytes)
    except Exception:
        cap = 64 * 1024 * 1024
    return max(32 * 1024 * 1024, int(cap * 0.85))


def _heads_per_group(num_heads, head_dim):
    # Group heads so each attn_scr store is ~128 lanes wide (lane-dense vst).
    if head_dim >= 128:
        return 1
    g = min(num_heads, max(1, 128 // head_dim))
    while num_heads % g:
        g -= 1
    return g


def _pick_batch_block(batch, seq, target_rows=512):
    # Largest divisor of `batch` with Bblk*S <= target_rows, keeping >= 2
    # batch blocks when possible so both v7x TensorCores get work.
    best = 1
    for cand in range(1, batch + 1):
        if batch % cand:
            continue
        if batch >= 2 and batch // cand < 2:
            continue
        if cand * seq <= target_rows:
            best = cand
    return best


# ----------------------------------------------------------------------------
# Row-tiled linear for the standalone output projection.
# ----------------------------------------------------------------------------
def _linear_kernel(x_ref, w_ref, b_ref, o_ref):
    o_ref[...] = (
        jnp.dot(x_ref[...], w_ref[...], preferred_element_type=jnp.float32)
        + b_ref[...]
    ).astype(o_ref.dtype)


def linear(x, w, b, *, row_tile=512):
    B, S, Din = x.shape
    Dout = w.shape[1]
    rows = B * S
    tile = min(row_tile, _round_up(rows, 8))
    padded = _round_up(rows, tile)
    xr = x.reshape(rows, Din).astype(jnp.bfloat16)
    if padded != rows:
        xr = jnp.pad(xr, ((0, padded - rows), (0, 0)))
    out = pl.pallas_call(
        _linear_kernel,
        out_shape=jax.ShapeDtypeStruct((padded, Dout), jnp.float32),
        grid=(padded // tile,),
        in_specs=[
            pl.BlockSpec((tile, Din), lambda i: (i, 0)),
            pl.BlockSpec((Din, Dout), lambda i: (0, 0)),
            pl.BlockSpec((1, Dout), lambda i: (0, 0)),
        ],
        out_specs=pl.BlockSpec((tile, Dout), lambda i: (i, 0)),
        compiler_params=pltpu.CompilerParams(dimension_semantics=("parallel",)),
    )(xr, w.astype(jnp.bfloat16), b)
    return out[:rows].reshape(B, S, Dout)


# ----------------------------------------------------------------------------
# Fused stack of TransformerEncoderLayers (norm_first=False, post-norm).
# ----------------------------------------------------------------------------
def _layer_norm(x, gamma, beta, eps):
    mu = jnp.mean(x, axis=-1, keepdims=True)
    var = jnp.mean((x - mu) ** 2, axis=-1, keepdims=True)
    return (x - mu) * lax.rsqrt(var + eps) * gamma + beta


def _encoder_stack_kernel(*refs, num_heads, eps, bblk, seq, fuse_input,
                          heads_per_group, ffn_chunk):
    if fuse_input:
        (x_ref, bias_ref, win_ref, bin_ref,
         wqkv_ref, bqkv_ref, wo_ref, bo_ref,
         ln1g_ref, ln1b_ref, w1_ref, b1_ref, w2_ref, b2_ref,
         ln2g_ref, ln2b_ref, o_ref, qkv_scr, attn_scr) = refs
    else:
        (x_ref, bias_ref,
         wqkv_ref, bqkv_ref, wo_ref, bo_ref,
         ln1g_ref, ln1b_ref, w1_ref, b1_ref, w2_ref, b2_ref,
         ln2g_ref, ln2b_ref, o_ref, qkv_scr, attn_scr) = refs
        win_ref = bin_ref = None

    layer = pl.program_id(1)
    rows, D = o_ref.shape
    Dh = D // num_heads
    F = w1_ref.shape[-1]
    n_groups = num_heads // heads_per_group
    gw = heads_per_group * Dh

    # ---- layer 0: seed the VMEM-resident activation carry for this block ----
    @pl.when(layer == 0)
    def _():
        if fuse_input:
            # fused input projection (no HBM round-trip of the projected x)
            o_ref[...] = (
                jnp.dot(x_ref[...].astype(jnp.bfloat16), win_ref[...],
                        preferred_element_type=jnp.float32) + bin_ref[...])
        else:
            o_ref[...] = x_ref[...]

    x = o_ref[...]                                # (rows, D) f32 carry
    xb = x.astype(jnp.bfloat16)

    # ---- fused QKV projection on the whole (Bblk*S, D) slab ----
    qkv = (jnp.dot(xb, wqkv_ref[0], preferred_element_type=jnp.float32)
           + bqkv_ref[0])
    # Fold 1/sqrt(Dh) into q, cast q/k/v to bf16 ONCE, park in VMEM scratch.
    qkv_scr[:, :D] = (qkv[:, :D] * (Dh ** -0.5)).astype(jnp.bfloat16)
    qkv_scr[:, D:] = qkv[:, D:].astype(jnp.bfloat16)

    # ---- attention: fori_loop over batch rows of the block ----
    dn = (((1,), (1,)), ((), ()))                 # q @ k.T without transpose

    def attend(b, carry):
        r0 = b * seq
        if seq % 8 == 0:
            r0 = pl.multiple_of(r0, 8)
        neg_bias = bias_ref[b]                    # (1, S) additive key-pad mask
        for g in range(n_groups):                 # static; one dense store/group
            parts = []
            for hi in range(heads_per_group):
                c = (g * heads_per_group + hi) * Dh
                qh = qkv_scr[pl.ds(r0, seq), c:c + Dh]
                kh = qkv_scr[pl.ds(r0, seq), D + c:D + c + Dh]
                vh = qkv_scr[pl.ds(r0, seq), 2 * D + c:2 * D + c + Dh]
                s = lax.dot_general(qh, kh, dn,
                                    preferred_element_type=jnp.float32)
                s = s + neg_bias                  # mask padded keys
                s = s - jnp.max(s, axis=-1, keepdims=True)
                p = jnp.exp(s)
                inv = pl.reciprocal(jnp.sum(p, axis=-1, keepdims=True),
                                    approx=True)
                p = (p * inv).astype(jnp.bfloat16)
                parts.append(jnp.dot(p, vh, preferred_element_type=jnp.float32))
            blk = parts[0] if len(parts) == 1 else jnp.concatenate(parts, -1)
            attn_scr[pl.ds(r0, seq), g * gw:(g + 1) * gw] = blk.astype(
                jnp.bfloat16)
        return carry

    lax.fori_loop(0, bblk, attend, 0)

    attn = (jnp.dot(attn_scr[...], wo_ref[0],
                    preferred_element_type=jnp.float32) + bo_ref[0])

    # ---- residual + post-norm 1 (f32) ----
    x = _layer_norm(x + attn, ln1g_ref[0], ln1b_ref[0], eps)

    # ---- feed-forward, chunked over F to bound the (rows, F) intermediate ----
    # TODO(synk): for very large F on v7x, additionally tile the w1/w2 weight
    # DMA itself (emit_pipeline over F) instead of only chunking the compute.
    xb2 = x.astype(jnp.bfloat16)
    ff = jnp.zeros((rows, D), jnp.float32)
    for c0 in range(0, F, ffn_chunk):
        c1 = min(F, c0 + ffn_chunk)
        h1 = (jnp.dot(xb2, w1_ref[0, :, c0:c1],
                      preferred_element_type=jnp.float32) + b1_ref[0, :, c0:c1])
        h1 = jnp.maximum(h1, 0.0).astype(jnp.bfloat16)
        ff = ff + jnp.dot(h1, w2_ref[0, c0:c1, :],
                          preferred_element_type=jnp.float32)
    ff = ff + b2_ref[0]

    # ---- residual + post-norm 2; store the carry (== output on last layer) ----
    o_ref[...] = _layer_norm(x + ff, ln2g_ref[0], ln2b_ref[0], eps).astype(
        o_ref.dtype)


def encoder_stack(x_flat, neg_bias, sp, *, num_heads, batch, seq,
                  w_in=None, b_in=None, eps=1e-5, ffn_chunk=2048):
    rows_total, Din = x_flat.shape
    L, D, F = sp["w1"].shape
    assert D % num_heads == 0
    Dh = D // num_heads
    fuse_input = w_in is not None
    hpg = _heads_per_group(num_heads, Dh)

    bblk = _pick_batch_block(batch, seq)
    if (bblk * seq) % 8 != 0:
        bblk = batch                       # fall back to one full-array block
    nb = batch // bblk
    rows = bblk * seq

    kern = functools.partial(
        _encoder_stack_kernel, num_heads=num_heads, eps=eps, bblk=bblk,
        seq=seq, fuse_input=fuse_input, heads_per_group=hpg,
        ffn_chunk=min(ffn_chunk, F))

    wspec = lambda shape: pl.BlockSpec(shape, lambda i, l: (l, 0, 0))
    in_specs = [
        pl.BlockSpec((rows, Din), lambda i, l: (i, 0)),       # x (fetched 1x/i)
        pl.BlockSpec((bblk, 1, seq), lambda i, l: (i, 0, 0)), # key-padding bias
    ]
    inputs = [x_flat, neg_bias]
    if fuse_input:
        in_specs += [pl.BlockSpec((Din, D), lambda i, l: (0, 0)),
                     pl.BlockSpec((1, D), lambda i, l: (0, 0))]
        inputs += [w_in.astype(jnp.bfloat16), b_in]
    in_specs += [
        wspec((1, D, 3 * D)), wspec((1, 1, 3 * D)),           # fused qkv w/b
        wspec((1, D, D)), wspec((1, 1, D)),                   # out-proj w/b
        wspec((1, 1, D)), wspec((1, 1, D)),                   # ln1 gamma/beta
        wspec((1, D, F)), wspec((1, 1, F)),                   # ffn linear1 w/b
        wspec((1, F, D)), wspec((1, 1, D)),                   # ffn linear2 w/b
        wspec((1, 1, D)), wspec((1, 1, D)),                   # ln2 gamma/beta
    ]
    inputs += [sp["wqkv"], sp["bqkv"], sp["wo"], sp["bo"],
               sp["ln1_g"], sp["ln1_b"],
               sp["w1"], sp["b1"], sp["w2"], sp["b2"],
               sp["ln2_g"], sp["ln2_b"]]

    return pl.pallas_call(
        kern,
        out_shape=jax.ShapeDtypeStruct((rows_total, D), jnp.float32),
        grid=(nb, L),
        in_specs=in_specs,
        out_specs=pl.BlockSpec((rows, D), lambda i, l: (i, 0)),
        scratch_shapes=[pltpu.VMEM((rows, 3 * D), jnp.bfloat16),   # q|k|v bf16
                        pltpu.VMEM((rows, D), jnp.bfloat16)],      # head outs
        compiler_params=pltpu.CompilerParams(
            dimension_semantics=("parallel", "arbitrary"),
            vmem_limit_bytes=_vmem_limit_bytes(),
        ),
    )(*inputs)


def _stack_layer_params(layers):
    # Stack per-layer params along a leading layer axis; weights stored bf16
    # (halves weight DMA), biases / LayerNorm params stay f32.
    bf16 = jnp.bfloat16
    g = lambda name: jnp.stack([p[name] for p in layers])
    return {
        "wqkv": jnp.stack([jnp.concatenate([p["wq"], p["wk"], p["wv"]], axis=1)
                           for p in layers]).astype(bf16),           # (L, D, 3D)
        "bqkv": jnp.stack([jnp.concatenate([p["bq"], p["bk"], p["bv"]], axis=1)
                           for p in layers]),                         # (L, 1, 3D)
        "wo": g("wo").astype(bf16), "bo": g("bo"),
        "ln1_g": g("ln1_g"), "ln1_b": g("ln1_b"),
        "w1": g("w1").astype(bf16), "b1": g("b1"),
        "w2": g("w2").astype(bf16), "b2": g("b2"),
        "ln2_g": g("ln2_g"), "ln2_b": g("ln2_b"),
    }


# ----------------------------------------------------------------------------
# BaselineEncoder forward (dropout=0.0, norm_first=False)
# ----------------------------------------------------------------------------
def baseline_encoder_forward(embeddings, attention_mask, params,
                             *, num_heads, user_cls_only=False):
    B, S, Din = embeddings.shape
    # key_padding_mask = ~attention_mask -> additive bias on attention keys
    neg_bias = jnp.where(attention_mask, 0.0, -1e30).astype(jnp.float32)[:, None, :]

    stacked = _stack_layer_params(params["layers"])
    D = stacked["wo"].shape[-1]
    fuse_input = params["w_in"] is not None
    if not fuse_input:
        assert Din == D

    x_flat = embeddings.astype(jnp.float32).reshape(B * S, Din)
    y = encoder_stack(
        x_flat, neg_bias, stacked, num_heads=num_heads, batch=B, seq=S,
        w_in=(params["w_in"] if fuse_input else None),
        b_in=(params["b_in"] if fuse_input else None))
    y = y.reshape(B, S, D)

    if params["w_out"] is not None:          # _output_projection
        y = linear(y, params["w_out"], params["b_out"])
    if user_cls_only:
        y = y[:, 0, :]
        attention_mask = attention_mask[:, 0]
    return y, attention_mask


# ----------------------------------------------------------------------------
# Deterministic parameter init (mirrors _init_weights: trunc_normal std=0.02
# clipped at +-2*std for projection weights, ones/zeros for norms, zero biases)
# ----------------------------------------------------------------------------
def init_params(key, *, input_dim, hidden, ffn, num_layers, output_dim,
                initializer_range=0.02):
    def trunc(key, shape):
        return (jax.random.truncated_normal(key, -2.0, 2.0, shape, jnp.float32)
                * initializer_range)

    keys = iter(jax.random.split(key, 8 * num_layers + 4))
    params = {
        "w_in": trunc(next(keys), (input_dim, hidden)),
        "b_in": jnp.zeros((1, hidden), jnp.float32),
        "layers": [],
        "w_out": trunc(next(keys), (hidden, output_dim)),
        "b_out": jnp.zeros((1, output_dim), jnp.float32),
    }
    for _ in range(num_layers):
        params["layers"].append({
            "wq": trunc(next(keys), (hidden, hidden)),
            "bq": jnp.zeros((1, hidden), jnp.float32),
            "wk": trunc(next(keys), (hidden, hidden)),
            "bk": jnp.zeros((1, hidden), jnp.float32),
            "wv": trunc(next(keys), (hidden, hidden)),
            "bv": jnp.zeros((1, hidden), jnp.float32),
            "wo": trunc(next(keys), (hidden, hidden)),
            "bo": jnp.zeros((1, hidden), jnp.float32),
            "ln1_g": jnp.ones((1, hidden), jnp.float32),
            "ln1_b": jnp.zeros((1, hidden), jnp.float32),
            "w1": trunc(next(keys), (hidden, ffn)),
            "b1": jnp.zeros((1, ffn), jnp.float32),
            "w2": trunc(next(keys), (ffn, hidden)),
            "b2": jnp.zeros((1, hidden), jnp.float32),
            "ln2_g": jnp.ones((1, hidden), jnp.float32),
            "ln2_b": jnp.zeros((1, hidden), jnp.float32),
        })
    return params


if __name__ == "__main__":
    B, S = 2, 8
    INPUT_DIM, HIDDEN, FFN, OUTPUT_DIM = 16, 32, 64, 24
    NUM_LAYERS, NUM_HEADS = 2, 4

    root = jax.random.PRNGKey(0)
    k_x, k_p = jax.random.split(root)

    embeddings = jax.random.normal(k_x, (B, S, INPUT_DIM), jnp.float32)
    # attention_mask: True = valid token (forward internally uses ~mask as pad mask)
    attention_mask = jnp.array(
        [[True] * S,
         [True] * 5 + [False] * 3],
        dtype=jnp.bool_)

    params = init_params(k_p, input_dim=INPUT_DIM, hidden=HIDDEN, ffn=FFN,
                         num_layers=NUM_LAYERS, output_dim=OUTPUT_DIM)

    out, out_mask = baseline_encoder_forward(
        embeddings, attention_mask, params,
        num_heads=NUM_HEADS, user_cls_only=False)

    jax.block_until_ready(out)
    jax.block_until_ready(out_mask)
    assert out.shape == (B, S, OUTPUT_DIM)
    assert out_mask.shape == (B, S)
    print("KERNEL_OK")
</pallas_src>

<mosaic_0001>
module attributes {stable_mosaic.version = 11 : i64} {
  func.func @_encoder_stack_kernel(%arg0: i32, %arg1: i32, %arg2: memref<8x16xf32, #tpu.memory_space<vmem>>, %arg3: memref<1x1x8xf32, #tpu.memory_space<vmem>>, %arg4: memref<16x32xbf16, #tpu.memory_space<vmem>>, %arg5: memref<1x32xf32, #tpu.memory_space<vmem>>, %arg6: memref<1x32x96xbf16, #tpu.memory_space<vmem>>, %arg7: memref<1x1x96xf32, #tpu.memory_space<vmem>>, %arg8: memref<1x32x32xbf16, #tpu.memory_space<vmem>>, %arg9: memref<1x1x32xf32, #tpu.memory_space<vmem>>, %arg10: memref<1x1x32xf32, #tpu.memory_space<vmem>>, %arg11: memref<1x1x32xf32, #tpu.memory_space<vmem>>, %arg12: memref<1x32x64xbf16, #tpu.memory_space<vmem>>, %arg13: memref<1x1x64xf32, #tpu.memory_space<vmem>>, %arg14: memref<1x64x32xbf16, #tpu.memory_space<vmem>>, %arg15: memref<1x1x32xf32, #tpu.memory_space<vmem>>, %arg16: memref<1x1x32xf32, #tpu.memory_space<vmem>>, %arg17: memref<1x1x32xf32, #tpu.memory_space<vmem>>, %arg18: memref<8x32xf32, #tpu.memory_space<vmem>>, %arg19: memref<8x96xbf16, #tpu.memory_space<vmem>>, %arg20: memref<8x32xbf16, #tpu.memory_space<vmem>>) attributes {dimension_semantics = [#tpu.dimension_semantics<parallel>, #tpu.dimension_semantics<arbitrary>], iteration_bounds = array<i64: 2, 2>, scalar_prefetch = 0 : i64, scratch_operands = 2 : i64, tpu.core_type = #tpu.core_type<tc>, window_params = [{transform_indices = @transform_0, window_bounds = array<i64: 8, 16>}, {transform_indices = @transform_1, window_bounds = array<i64: 1, 1, 8>}, {pipeline_mode = #tpu.pipeline_mode<synchronous>, transform_indices = @transform_2, window_bounds = array<i64: 16, 32>}, {pipeline_mode = #tpu.pipeline_mode<synchronous>, transform_indices = @transform_3, window_bounds = array<i64: 1, 32>}, {transform_indices = @transform_4, window_bounds = array<i64: 1, 32, 96>}, {transform_indices = @transform_5, window_bounds = array<i64: 1, 1, 96>}, {transform_indices = @transform_6, window_bounds = array<i64: 1, 32, 32>}, {transform_indices = @transform_7, window_bounds = array<i64: 1, 1, 32>}, {transform_indices = @transform_8, window_bounds = array<i64: 1, 1, 32>}, {transform_indices = @transform_9, window_bounds = array<i64: 1, 1, 32>}, {transform_indices = @transform_10, window_bounds = array<i64: 1, 32, 64>}, {transform_indices = @transform_11, window_bounds = array<i64: 1, 1, 64>}, {transform_indices = @transform_12, window_bounds = array<i64: 1, 64, 32>}, {transform_indices = @transform_13, window_bounds = array<i64: 1, 1, 32>}, {transform_indices = @transform_14, window_bounds = array<i64: 1, 1, 32>}, {transform_indices = @transform_15, window_bounds = array<i64: 1, 1, 32>}, {transform_indices = @transform_16, window_bounds = array<i64: 8, 32>}]} {
    %c0_i32 = arith.constant 0 : i32
    %0 = arith.cmpi eq, %arg1, %c0_i32 : i32
    %1 = arith.extui %0 : i1 to i32
    %c0_i32_0 = arith.constant 0 : i32
    %2 = arith.cmpi ne, %1, %c0_i32_0 : i32
    scf.if %2 {
      %c0_83 = arith.constant 0 : index
      %c0_84 = arith.constant 0 : index
      %196 = vector.load %arg2[%c0_83, %c0_84] : memref<8x16xf32, #tpu.memory_space<vmem>>, vector<8x16xf32>
      %197 = arith.truncf %196 : vector<8x16xf32> to vector<8x16xbf16>
      %c0_85 = arith.constant 0 : index
      %c0_86 = arith.constant 0 : index
      %198 = vector.load %arg4[%c0_85, %c0_86] : memref<16x32xbf16, #tpu.memory_space<vmem>>, vector<16x32xbf16>
      %cst_87 = arith.constant dense<0.000000e+00> : vector<8x32xf32>
      %199 = tpu.matmul %197, %198, %cst_87 {dimension_numbers = #tpu.dot_dimension_numbers<[1], [0], [0], [1], [0, 0, 1, 1], [], []>} : vector<8x16xbf16>, vector<16x32xbf16>, vector<8x32xf32> -> vector<8x32xf32>
      %c0_88 = arith.constant 0 : index
      %c0_89 = arith.constant 0 : index
      %200 = vector.load %arg5[%c0_88, %c0_89] : memref<1x32xf32, #tpu.memory_space<vmem>>, vector<1x32xf32>
      %201 = vector.broadcast %200 : vector<1x32xf32> to vector<8x32xf32>
      %202 = arith.addf %199, %201 : vector<8x32xf32>
      %c0_90 = arith.constant 0 : index
      %c0_91 = arith.constant 0 : index
      %203 = vector.load %arg18[%c0_90, %c0_91] : memref<8x32xf32, #tpu.memory_space<vmem>>, vector<8x32xf32>
      tpu.vector_store %arg18[%c0_90, %c0_91], %202 {strides = array<i32>} : memref<8x32xf32, #tpu.memory_space<vmem>>, vector<8x32xf32>,
    } else {
    }
    %c0 = arith.constant 0 : index
    %c0_1 = arith.constant 0 : index
    %3 = vector.load %arg18[%c0, %c0_1] : memref<8x32xf32, #tpu.memory_space<vmem>>, vector<8x32xf32>
    %4 = arith.truncf %3 : vector<8x32xf32> to vector<8x32xbf16>
    %c0_2 = arith.constant 0 : index
    %c0_3 = arith.constant 0 : index
    %c0_4 = arith.constant 0 : index
    %5 = vector.load %arg6[%c0_2, %c0_3, %c0_4] : memref<1x32x96xbf16, #tpu.memory_space<vmem>>, vector<1x32x96xbf16>
    %6 = vector.shape_cast %5 : vector<1x32x96xbf16> to vector<32x96xbf16>
    %cst = arith.constant dense<0.000000e+00> : vector<8x96xf32>
    %7 = tpu.matmul %4, %6, %cst {dimension_numbers = #tpu.dot_dimension_numbers<[1], [0], [0], [1], [0, 0, 1, 1], [], []>} : vector<8x32xbf16>, vector<32x96xbf16>, vector<8x96xf32> -> vector<8x96xf32>
    %c0_5 = arith.constant 0 : index
    %c0_6 = arith.constant 0 : index
    %c0_7 = arith.constant 0 : index
    %8 = vector.load %arg7[%c0_5, %c0_6, %c0_7] : memref<1x1x96xf32, #tpu.memory_space<vmem>>, vector<1x1x96xf32>
    %9 = vector.shape_cast %8 : vector<1x1x96xf32> to vector<1x96xf32>
    %10 = vector.broadcast %9 : vector<1x96xf32> to vector<8x96xf32>
    %11 = arith.addf %7, %10 : vector<8x96xf32>
    %12 = vector.extract_strided_slice %11 {offsets = [0, 0], sizes = [8, 32], strides = [1, 1]} : vector<8x96xf32> to vector<8x32xf32>
    %cst_8 = arith.constant 0.353553385 : f32
    %13 = vector.broadcast %cst_8 : f32 to vector<8x32xf32>
    %14 = arith.mulf %12, %13 : vector<8x32xf32>
    %15 = arith.truncf %14 : vector<8x32xf32> to vector<8x32xbf16>
    %c0_9 = arith.constant 0 : index
    %c0_10 = arith.constant 0 : index
    %16 = vector.load %arg19[%c0_9, %c0_10] : memref<8x96xbf16, #tpu.memory_space<vmem>>, vector<8x32xbf16>
    tpu.vector_store %arg19[%c0_9, %c0_10], %15 {strides = array<i32>} : memref<8x96xbf16, #tpu.memory_space<vmem>>, vector<8x32xbf16>,
    %17 = vector.extract_strided_slice %11 {offsets = [0, 32], sizes = [8, 64], strides = [1, 1]} : vector<8x96xf32> to vector<8x64xf32>
    %18 = arith.truncf %17 : vector<8x64xf32> to vector<8x64xbf16>
    %c0_11 = arith.constant 0 : index
    %c32 = arith.constant 32 : index
    %19 = vector.load %arg19[%c0_11, %c32] : memref<8x96xbf16, #tpu.memory_space<vmem>>, vector<8x64xbf16>
    tpu.vector_store %arg19[%c0_11, %c32], %18 {strides = array<i32>} : memref<8x96xbf16, #tpu.memory_space<vmem>>, vector<8x64xbf16>,
    %c0_i32_12 = arith.constant 0 : i32
    %c8_i32 = arith.constant 8 : i32
    %20 = arith.muli %c0_i32_12, %c8_i32 : i32
    %21 = tpu.assume_multiple %20, 8 : i32
    %22 = arith.index_cast %c0_i32_12 : i32 to index
    %c0_13 = arith.constant 0 : index
    %c0_14 = arith.constant 0 : index
    %23 = vector.load %arg3[%22, %c0_13, %c0_14] : memref<1x1x8xf32, #tpu.memory_space<vmem>>, vector<1x1x8xf32>
    %24 = vector.shape_cast %23 : vector<1x1x8xf32> to vector<1x8xf32>
    %25 = arith.index_cast %21 : i32 to index
    %c0_15 = arith.constant 0 : index
    %26 = vector.load %arg19[%25, %c0_15] : memref<8x96xbf16, #tpu.memory_space<vmem>>, vector<8x8xbf16>
    %27 = arith.index_cast %21 : i32 to index
    %c32_16 = arith.constant 32 : index
    %28 = vector.load %arg19[%27, %c32_16] : memref<8x96xbf16, #tpu.memory_space<vmem>>, vector<8x8xbf16>
    %29 = arith.index_cast %21 : i32 to index
    %c64 = arith.constant 64 : index
    %30 = vector.load %arg19[%29, %c64] : memref<8x96xbf16, #tpu.memory_space<vmem>>, vector<8x8xbf16>
    %cst_17 = arith.constant dense<0.000000e+00> : vector<8x8xf32>
    %31 = tpu.matmul %26, %28, %cst_17 {dimension_numbers = #tpu.dot_dimension_numbers<[1], [1], [0], [0], [0, 0, 1, 0], [], []>} : vector<8x8xbf16>, vector<8x8xbf16>, vector<8x8xf32> -> vector<8x8xf32>
    %32 = vector.broadcast %24 : vector<1x8xf32> to vector<8x8xf32>
    %33 = arith.addf %31, %32 : vector<8x8xf32>
    %cst_18 = arith.constant dense<0xFF800000> : vector<8xf32>
    %34 = vector.multi_reduction <maximumf>, %33, %cst_18 [1] : vector<8x8xf32> to vector<8xf32>
    %35 = vector.shape_cast %34 : vector<8xf32> to vector<8x1xf32>
    %36 = vector.broadcast %35 : vector<8x1xf32> to vector<8x8xf32>
    %37 = arith.subf %33, %36 : vector<8x8xf32>
    %38 = math.exp %37 : vector<8x8xf32>
    %cst_19 = arith.constant dense<0.000000e+00> : vector<8xf32>
    %39 = vector.multi_reduction <add>, %38, %cst_19 [1] : vector<8x8xf32> to vector<8xf32>
    %40 = vector.shape_cast %39 : vector<8xf32> to vector<8x1xf32>
    %41 = tpu.reciprocal %40 {approx = true} : vector<8x1xf32> -> vector<8x1xf32>
    %42 = vector.broadcast %41 : vector<8x1xf32> to vector<8x8xf32>
    %43 = arith.mulf %38, %42 : vector<8x8xf32>
    %44 = arith.truncf %43 : vector<8x8xf32> to vector<8x8xbf16>
    %cst_20 = arith.constant dense<0.000000e+00> : vector<8x8xf32>
    %45 = tpu.matmul %44, %30, %cst_20 {dimension_numbers = #tpu.dot_dimension_numbers<[1], [0], [0], [1], [0, 0, 1, 1], [], []>} : vector<8x8xbf16>, vector<8x8xbf16>, vector<8x8xf32> -> vector<8x8xf32>
    %46 = arith.index_cast %21 : i32 to index
    %c8 = arith.constant 8 : index
    %47 = vector.load %arg19[%46, %c8] : memref<8x96xbf16, #tpu.memory_space<vmem>>, vector<8x8xbf16>
    %48 = arith.index_cast %21 : i32 to index
    %c40 = arith.constant 40 : index
    %49 = vector.load %arg19[%48, %c40] : memref<8x96xbf16, #tpu.memory_space<vmem>>, vector<8x8xbf16>
    %50 = arith.index_cast %21 : i32 to index
    %c72 = arith.constant 72 : index
    %51 = vector.load %arg19[%50, %c72] : memref<8x96xbf16, #tpu.memory_space<vmem>>, vector<8x8xbf16>
    %cst_21 = arith.constant dense<0.000000e+00> : vector<8x8xf32>
    %52 = tpu.matmul %47, %49, %cst_21 {dimension_numbers = #tpu.dot_dimension_numbers<[1], [1], [0], [0], [0, 0, 1, 0], [], []>} : vector<8x8xbf16>, vector<8x8xbf16>, vector<8x8xf32> -> vector<8x8xf32>
    %53 = vector.broadcast %24 : vector<1x8xf32> to vector<8x8xf32>
    %54 = arith.addf %52, %53 : vector<8x8xf32>
    %cst_22 = arith.constant dense<0xFF800000> : vector<8xf32>
    %55 = vector.multi_reduction <maximumf>, %54, %cst_22 [1] : vector<8x8xf32> to vector<8xf32>
    %56 = vector.shape_cast %55 : vector<8xf32> to vector<8x1xf32>
    %57 = vector.broadcast %56 : vector<8x1xf32> to vector<8x8xf32>
    %58 = arith.subf %54, %57 : vector<8x8xf32>
    %59 = math.exp %58 : vector<8x8xf32>
    %cst_23 = arith.constant dense<0.000000e+00> : vector<8xf32>
    %60 = vector.multi_reduction <add>, %59, %cst_23 [1] : vector<8x8xf32> to vector<8xf32>
    %61 = vector.shape_cast %60 : vector<8xf32> to vector<8x1xf32>
    %62 = tpu.reciprocal %61 {approx = true} : vector<8x1xf32> -> vector<8x1xf32>
    %63 = vector.broadcast %62 : vector<8x1xf32> to vector<8x8xf32>
    %64 = arith.mulf %59, %63 : vector<8x8xf32>
    %65 = arith.truncf %64 : vector<8x8xf32> to vector<8x8xbf16>
    %cst_24 = arith.constant dense<0.000000e+00> : vector<8x8xf32>
    %66 = tpu.matmul %65, %51, %cst_24 {dimension_numbers = #tpu.dot_dimension_numbers<[1], [0], [0], [1], [0, 0, 1, 1], [], []>} : vector<8x8xbf16>, vector<8x8xbf16>, vector<8x8xf32> -> vector<8x8xf32>
    %67 = arith.index_cast %21 : i32 to index
    %c16 = arith.constant 16 : index
    %68 = vector.load %arg19[%67, %c16] : memref<8x96xbf16, #tpu.memory_space<vmem>>, vector<8x8xbf16>
    %69 = arith.index_cast %21 : i32 to index
    %c48 = arith.constant 48 : index
    %70 = vector.load %arg19[%69, %c48] : memref<8x96xbf16, #tpu.memory_space<vmem>>, vector<8x8xbf16>
    %71 = arith.index_cast %21 : i32 to index
    %c80 = arith.constant 80 : index
    %72 = vector.load %arg19[%71, %c80] : memref<8x96xbf16, #tpu.memory_space<vmem>>, vector<8x8xbf16>
    %cst_25 = arith.constant dense<0.000000e+00> : vector<8x8xf32>
    %73 = tpu.matmul %68, %70, %cst_25 {dimension_numbers = #tpu.dot_dimension_numbers<[1], [1], [0], [0], [0, 0, 1, 0], [], []>} : vector<8x8xbf16>, vector<8x8xbf16>, vector<8x8xf32> -> vector<8x8xf32>
    %74 = vector.broadcast %24 : vector<1x8xf32> to vector<8x8xf32>
    %75 = arith.addf %73, %74 : vector<8x8xf32>
    %cst_26 = arith.constant dense<0xFF800000> : vector<8xf32>
    %76 = vector.multi_reduction <maximumf>, %75, %cst_26 [1] : vector<8x8xf32> to vector<8xf32>
    %77 = vector.shape_cast %76 : vector<8xf32> to vector<8x1xf32>
    %78 = vector.broadcast %77 : vector<8x1xf32> to vector<8x8xf32>
    %79 = arith.subf %75, %78 : vector<8x8xf32>
    %80 = math.exp %79 : vector<8x8xf32>
    %cst_27 = arith.constant dense<0.000000e+00> : vector<8xf32>
    %81 = vector.multi_reduction <add>, %80, %cst_27 [1] : vector<8x8xf32> to vector<8xf32>
    %82 = vector.shape_cast %81 : vector<8xf32> to vector<8x1xf32>
    %83 = tpu.reciprocal %82 {approx = true} : vector<8x1xf32> -> vector<8x1xf32>
    %84 = vector.broadcast %83 : vector<8x1xf32> to vector<8x8xf32>
    %85 = arith.mulf %80, %84 : vector<8x8xf32>
    %86 = arith.truncf %85 : vector<8x8xf32> to vector<8x8xbf16>
    %cst_28 = arith.constant dense<0.000000e+00> : vector<8x8xf32>
    %87 = tpu.matmul %86, %72, %cst_28 {dimension_numbers = #tpu.dot_dimension_numbers<[1], [0], [0], [1], [0, 0, 1, 1], [], []>} : vector<8x8xbf16>, vector<8x8xbf16>, vector<8x8xf32> -> vector<8x8xf32>
    %88 = arith.index_cast %21 : i32 to index
    %c24 = arith.constant 24 : index
    %89 = vector.load %arg19[%88, %c24] : memref<8x96xbf16, #tpu.memory_space<vmem>>, vector<8x8xbf16>
    %90 = arith.index_cast %21 : i32 to index
    %c56 = arith.constant 56 : index
    %91 = vector.load %arg19[%90, %c56] : memref<8x96xbf16, #tpu.memory_space<vmem>>, vector<8x8xbf16>
    %92 = arith.index_cast %21 : i32 to index
    %c88 = arith.constant 88 : index
    %93 = vector.load %arg19[%92, %c88] : memref<8x96xbf16, #tpu.memory_space<vmem>>, vector<8x8xbf16>
    %cst_29 = arith.constant dense<0.000000e+00> : vector<8x8xf32>
    %94 = tpu.matmul %89, %91, %cst_29 {dimension_numbers = #tpu.dot_dimension_numbers<[1], [1], [0], [0], [0, 0, 1, 0], [], []>} : vector<8x8xbf16>, vector<8x8xbf16>, vector<8x8xf32> -> vector<8x8xf32>
    %95 = vector.broadcast %24 : vector<1x8xf32> to vector<8x8xf32>
    %96 = arith.addf %94, %95 : vector<8x8xf32>
    %cst_30 = arith.constant dense<0xFF800000> : vector<8xf32>
    %97 = vector.multi_reduction <maximumf>, %96, %cst_30 [1] : vector<8x8xf32> to vector<8xf32>
    %98 = vector.shape_cast %97 : vector<8xf32> to vector<8x1xf32>
    %99 = vector.broadcast %98 : vector<8x1xf32> to vector<8x8xf32>
    %100 = arith.subf %96, %99 : vector<8x8xf32>
    %101 = math.exp %100 : vector<8x8xf32>
    %cst_31 = arith.constant dense<0.000000e+00> : vector<8xf32>
    %102 = vector.multi_reduction <add>, %101, %cst_31 [1] : vector<8x8xf32> to vector<8xf32>
    %103 = vector.shape_cast %102 : vector<8xf32> to vector<8x1xf32>
    %104 = tpu.reciprocal %103 {approx = true} : vector<8x1xf32> -> vector<8x1xf32>
    %105 = vector.broadcast %104 : vector<8x1xf32> to vector<8x8xf32>
    %106 = arith.mulf %101, %105 : vector<8x8xf32>
    %107 = arith.truncf %106 : vector<8x8xf32> to vector<8x8xbf16>
    %cst_32 = arith.constant dense<0.000000e+00> : vector<8x8xf32>
    %108 = tpu.matmul %107, %93, %cst_32 {dimension_numbers = #tpu.dot_dimension_numbers<[1], [0], [0], [1], [0, 0, 1, 1], [], []>} : vector<8x8xbf16>, vector<8x8xbf16>, vector<8x8xf32> -> vector<8x8xf32>
    %109 = tpu.concatenate %45, %66, %87, %108 in 1 : vector<8x8xf32>, vector<8x8xf32>, vector<8x8xf32>, vector<8x8xf32> -> vector<8x32xf32>
    %110 = arith.truncf %109 : vector<8x32xf32> to vector<8x32xbf16>
    %111 = arith.index_cast %21 : i32 to index
    %c0_33 = arith.constant 0 : index
    %112 = vector.load %arg20[%111, %c0_33] : memref<8x32xbf16, #tpu.memory_space<vmem>>, vector<8x32xbf16>
    tpu.vector_store %arg20[%111, %c0_33], %110 {strides = array<i32>} : memref<8x32xbf16, #tpu.memory_space<vmem>>, vector<8x32xbf16>,
    %c1_i32 = arith.constant 1 : i32
    %c0_34 = arith.constant 0 : index
    %c0_35 = arith.constant 0 : index
    %113 = vector.load %arg20[%c0_34, %c0_35] : memref<8x32xbf16, #tpu.memory_space<vmem>>, vector<8x32xbf16>
    %c0_36 = arith.constant 0 : index
    %c0_37 = arith.constant 0 : index
    %c0_38 = arith.constant 0 : index
    %114 = vector.load %arg8[%c0_36, %c0_37, %c0_38] : memref<1x32x32xbf16, #tpu.memory_space<vmem>>, vector<1x32x32xbf16>
    %115 = vector.shape_cast %114 : vector<1x32x32xbf16> to vector<32x32xbf16>
    %cst_39 = arith.constant dense<0.000000e+00> : vector<8x32xf32>
    %116 = tpu.matmul %113, %115, %cst_39 {dimension_numbers = #tpu.dot_dimension_numbers<[1], [0], [0], [1], [0, 0, 1, 1], [], []>} : vector<8x32xbf16>, vector<32x32xbf16>, vector<8x32xf32> -> vector<8x32xf32>
    %c0_40 = arith.constant 0 : index
    %c0_41 = arith.constant 0 : index
    %c0_42 = arith.constant 0 : index
    %117 = vector.load %arg9[%c0_40, %c0_41, %c0_42] : memref<1x1x32xf32, #tpu.memory_space<vmem>>, vector<1x1x32xf32>
    %118 = vector.shape_cast %117 : vector<1x1x32xf32> to vector<1x32xf32>
    %119 = vector.broadcast %118 : vector<1x32xf32> to vector<8x32xf32>
    %120 = arith.addf %116, %119 : vector<8x32xf32>
    %121 = arith.addf %3, %120 : vector<8x32xf32>
    %c0_43 = arith.constant 0 : index
    %c0_44 = arith.constant 0 : index
    %c0_45 = arith.constant 0 : index
    %122 = vector.load %arg10[%c0_43, %c0_44, %c0_45] : memref<1x1x32xf32, #tpu.memory_space<vmem>>, vector<1x1x32xf32>
    %123 = vector.shape_cast %122 : vector<1x1x32xf32> to vector<1x32xf32>
    %c0_46 = arith.constant 0 : index
    %c0_47 = arith.constant 0 : index
    %c0_48 = arith.constant 0 : index
    %124 = vector.load %arg11[%c0_46, %c0_47, %c0_48] : memref<1x1x32xf32, #tpu.memory_space<vmem>>, vector<1x1x32xf32>
    %125 = vector.shape_cast %124 : vector<1x1x32xf32> to vector<1x32xf32>
    %cst_49 = arith.constant dense<0.000000e+00> : vector<8xf32>
    %126 = vector.multi_reduction <add>, %121, %cst_49 [1] : vector<8x32xf32> to vector<8xf32>
    %127 = vector.shape_cast %126 : vector<8xf32> to vector<8x1xf32>
    %cst_50 = arith.constant 3.200000e+01 : f32
    %128 = vector.broadcast %cst_50 : f32 to vector<8x1xf32>
    %129 = arith.divf %127, %128 : vector<8x1xf32>
    %130 = vector.broadcast %129 : vector<8x1xf32> to vector<8x32xf32>
    %131 = arith.subf %121, %130 : vector<8x32xf32>
    %132 = arith.mulf %131, %131 : vector<8x32xf32>
    %cst_51 = arith.constant dense<0.000000e+00> : vector<8xf32>
    %133 = vector.multi_reduction <add>, %132, %cst_51 [1] : vector<8x32xf32> to vector<8xf32>
    %134 = vector.shape_cast %133 : vector<8xf32> to vector<8x1xf32>
    %cst_52 = arith.constant 3.200000e+01 : f32
    %135 = vector.broadcast %cst_52 : f32 to vector<8x1xf32>
    %136 = arith.divf %134, %135 : vector<8x1xf32>
    %137 = vector.broadcast %129 : vector<8x1xf32> to vector<8x32xf32>
    %138 = arith.subf %121, %137 : vector<8x32xf32>
    %cst_53 = arith.constant 9.99999974E-6 : f32
    %139 = vector.broadcast %cst_53 : f32 to vector<8x1xf32>
    %140 = arith.addf %136, %139 : vector<8x1xf32>
    %141 = math.rsqrt %140 : vector<8x1xf32>
    %142 = vector.broadcast %141 : vector<8x1xf32> to vector<8x32xf32>
    %143 = arith.mulf %138, %142 : vector<8x32xf32>
    %144 = vector.broadcast %123 : vector<1x32xf32> to vector<8x32xf32>
    %145 = arith.mulf %143, %144 : vector<8x32xf32>
    %146 = vector.broadcast %125 : vector<1x32xf32> to vector<8x32xf32>
    %147 = arith.addf %145, %146 : vector<8x32xf32>
    %148 = arith.truncf %147 : vector<8x32xf32> to vector<8x32xbf16>
    %cst_54 = arith.constant 0.000000e+00 : f32
    %149 = vector.broadcast %cst_54 : f32 to vector<8x32xf32>
    %c0_55 = arith.constant 0 : index
    %c0_56 = arith.constant 0 : index
    %c0_57 = arith.constant 0 : index
    %150 = vector.load %arg12[%c0_55, %c0_56, %c0_57] : memref<1x32x64xbf16, #tpu.memory_space<vmem>>, vector<1x32x64xbf16>
    %151 = vector.shape_cast %150 : vector<1x32x64xbf16> to vector<32x64xbf16>
    %cst_58 = arith.constant dense<0.000000e+00> : vector<8x64xf32>
    %152 = tpu.matmul %148, %151, %cst_58 {dimension_numbers = #tpu.dot_dimension_numbers<[1], [0], [0], [1], [0, 0, 1, 1], [], []>} : vector<8x32xbf16>, vector<32x64xbf16>, vector<8x64xf32> -> vector<8x64xf32>
    %c0_59 = arith.constant 0 : index
    %c0_60 = arith.constant 0 : index
    %c0_61 = arith.constant 0 : index
    %153 = vector.load %arg13[%c0_59, %c0_60, %c0_61] : memref<1x1x64xf32, #tpu.memory_space<vmem>>, vector<1x1x64xf32>
    %154 = vector.shape_cast %153 : vector<1x1x64xf32> to vector<1x64xf32>
    %155 = vector.broadcast %154 : vector<1x64xf32> to vector<8x64xf32>
    %156 = arith.addf %152, %155 : vector<8x64xf32>
    %cst_62 = arith.constant 0.000000e+00 : f32
    %157 = vector.broadcast %cst_62 : f32 to vector<8x64xf32>
    %158 = arith.maximumf %156, %157 : vector<8x64xf32>
    %159 = arith.truncf %158 : vector<8x64xf32> to vector<8x64xbf16>
    %c0_63 = arith.constant 0 : index
    %c0_64 = arith.constant 0 : index
    %c0_65 = arith.constant 0 : index
    %160 = vector.load %arg14[%c0_63, %c0_64, %c0_65] : memref<1x64x32xbf16, #tpu.memory_space<vmem>>, vector<1x64x32xbf16>
    %161 = vector.shape_cast %160 : vector<1x64x32xbf16> to vector<64x32xbf16>
    %cst_66 = arith.constant dense<0.000000e+00> : vector<8x32xf32>
    %162 = tpu.matmul %159, %161, %cst_66 {dimension_numbers = #tpu.dot_dimension_numbers<[1], [0], [0], [1], [0, 0, 1, 1], [], []>} : vector<8x64xbf16>, vector<64x32xbf16>, vector<8x32xf32> -> vector<8x32xf32>
    %163 = arith.addf %149, %162 : vector<8x32xf32>
    %c0_67 = arith.constant 0 : index
    %c0_68 = arith.constant 0 : index
    %c0_69 = arith.constant 0 : index
    %164 = vector.load %arg15[%c0_67, %c0_68, %c0_69] : memref<1x1x32xf32, #tpu.memory_space<vmem>>, vector<1x1x32xf32>
    %165 = vector.shape_cast %164 : vector<1x1x32xf32> to vector<1x32xf32>
    %166 = vector.broadcast %165 : vector<1x32xf32> to vector<8x32xf32>
    %167 = arith.addf %163, %166 : vector<8x32xf32>
    %168 = arith.addf %147, %167 : vector<8x32xf32>
    %c0_70 = arith.constant 0 : index
    %c0_71 = arith.constant 0 : index
    %c0_72 = arith.constant 0 : index
    %169 = vector.load %arg16[%c0_70, %c0_71, %c0_72] : memref<1x1x32xf32, #tpu.memory_space<vmem>>, vector<1x1x32xf32>
    %170 = vector.shape_cast %169 : vector<1x1x32xf32> to vector<1x32xf32>
    %c0_73 = arith.constant 0 : index
    %c0_74 = arith.constant 0 : index
    %c0_75 = arith.constant 0 : index
    %171 = vector.load %arg17[%c0_73, %c0_74, %c0_75] : memref<1x1x32xf32, #tpu.memory_space<vmem>>, vector<1x1x32xf32>
    %172 = vector.shape_cast %171 : vector<1x1x32xf32> to vector<1x32xf32>
    %cst_76 = arith.constant dense<0.000000e+00> : vector<8xf32>
    %173 = vector.multi_reduction <add>, %168, %cst_76 [1] : vector<8x32xf32> to vector<8xf32>
    %174 = vector.shape_cast %173 : vector<8xf32> to vector<8x1xf32>
    %cst_77 = arith.constant 3.200000e+01 : f32
    %175 = vector.broadcast %cst_77 : f32 to vector<8x1xf32>
    %176 = arith.divf %174, %175 : vector<8x1xf32>
    %177 = vector.broadcast %176 : vector<8x1xf32> to vector<8x32xf32>
    %178 = arith.subf %168, %177 : vector<8x32xf32>
    %179 = arith.mulf %178, %178 : vector<8x32xf32>
    %cst_78 = arith.constant dense<0.000000e+00> : vector<8xf32>
    %180 = vector.multi_reduction <add>, %179, %cst_78 [1] : vector<8x32xf32> to vector<8xf32>
    %181 = vector.shape_cast %180 : vector<8xf32> to vector<8x1xf32>
    %cst_79 = arith.constant 3.200000e+01 : f32
    %182 = vector.broadcast %cst_79 : f32 to vector<8x1xf32>
    %183 = arith.divf %181, %182 : vector<8x1xf32>
    %184 = vector.broadcast %176 : vector<8x1xf32> to vector<8x32xf32>
    %185 = arith.subf %168, %184 : vector<8x32xf32>
    %cst_80 = arith.constant 9.99999974E-6 : f32
    %186 = vector.broadcast %cst_80 : f32 to vector<8x1xf32>
    %187 = arith.addf %183, %186 : vector<8x1xf32>
    %188 = math.rsqrt %187 : vector<8x1xf32>
    %189 = vector.broadcast %188 : vector<8x1xf32> to vector<8x32xf32>
    %190 = arith.mulf %185, %189 : vector<8x32xf32>
    %191 = vector.broadcast %170 : vector<1x32xf32> to vector<8x32xf32>
    %192 = arith.mulf %190, %191 : vector<8x32xf32>
    %193 = vector.broadcast %172 : vector<1x32xf32> to vector<8x32xf32>
    %194 = arith.addf %192, %193 : vector<8x32xf32>
    %c0_81 = arith.constant 0 : index
    %c0_82 = arith.constant 0 : index
    %195 = vector.load %arg18[%c0_81, %c0_82] : memref<8x32xf32, #tpu.memory_space<vmem>>, vector<8x32xf32>
    tpu.vector_store %arg18[%c0_81, %c0_82], %194 {strides = array<i32>} : memref<8x32xf32, #tpu.memory_space<vmem>>, vector<8x32xf32>,
    return
  }
  func.func @transform_0(%arg0: i32, %arg1: i32) -> (i32, i32) {
    %c0_i32 = arith.constant 0 : i32
    %c0_i32_0 = arith.constant 0 : i32
    return %arg0, %c0_i32 : i32, i32
  }
  func.func @transform_1(%arg0: i32, %arg1: i32) -> (i32, i32, i32) {
    %c0_i32 = arith.constant 0 : i32
    %c0_i32_0 = arith.constant 0 : i32
    %c0_i32_1 = arith.constant 0 : i32
    return %arg0, %c0_i32, %c0_i32_0 : i32, i32, i32
  }
  func.func @transform_2(%arg0: i32, %arg1: i32) -> (i32, i32) {
    %c0_i32 = arith.constant 0 : i32
    %c0_i32_0 = arith.constant 0 : i32
    %c0_i32_1 = arith.constant 0 : i32
    return %c0_i32, %c0_i32_0 : i32, i32
  }
  func.func @transform_3(%arg0: i32, %arg1: i32) -> (i32, i32) {
    %c0_i32 = arith.constant 0 : i32
    %c0_i32_0 = arith.constant 0 : i32
    %c0_i32_1 = arith.constant 0 : i32
    return %c0_i32, %c0_i32_0 : i32, i32
  }
  func.func @transform_4(%arg0: i32, %arg1: i32) -> (i32, i32, i32) {
    %c0_i32 = arith.constant 0 : i32
    %c0_i32_0 = arith.constant 0 : i32
    %c0_i32_1 = arith.constant 0 : i32
    return %arg1, %c0_i32, %c0_i32_0 : i32, i32, i32
  }
  func.func @transform_5(%arg0: i32, %arg1: i32) -> (i32, i32, i32) {
    %c0_i32 = arith.constant 0 : i32
    %c0_i32_0 = arith.constant 0 : i32
    %c0_i32_1 = arith.constant 0 : i32
    return %arg1, %c0_i32, %c0_i32_0 : i32, i32, i32
  }
  func.func @transform_6(%arg0: i32, %arg1: i32) -> (i32, i32, i32) {
    %c0_i32 = arith.constant 0 : i32
    %c0_i32_0 = arith.constant 0 : i32
    %c0_i32_1 = arith.constant 0 : i32
    return %arg1, %c0_i32, %c0_i32_0 : i32, i32, i32
  }
  func.func @transform_7(%arg0: i32, %arg1: i32) -> (i32, i32, i32) {
    %c0_i32 = arith.constant 0 : i32
    %c0_i32_0 = arith.constant 0 : i32
    %c0_i32_1 = arith.constant 0 : i32
    return %arg1, %c0_i32, %c0_i32_0 : i32, i32, i32
  }
  func.func @transform_8(%arg0: i32, %arg1: i32) -> (i32, i32, i32) {
    %c0_i32 = arith.constant 0 : i32
    %c0_i32_0 = arith.constant 0 : i32
    %c0_i32_1 = arith.constant 0 : i32
    return %arg1, %c0_i32, %c0_i32_0 : i32, i32, i32
  }
  func.func @transform_9(%arg0: i32, %arg1: i32) -> (i32, i32, i32) {
    %c0_i32 = arith.constant 0 : i32
    %c0_i32_0 = arith.constant 0 : i32
    %c0_i32_1 = arith.constant 0 : i32
    return %arg1, %c0_i32, %c0_i32_0 : i32, i32, i32
  }
  func.func @transform_10(%arg0: i32, %arg1: i32) -> (i32, i32, i32) {
    %c0_i32 = arith.constant 0 : i32
    %c0_i32_0 = arith.constant 0 : i32
    %c0_i32_1 = arith.constant 0 : i32
    return %arg1, %c0_i32, %c0_i32_0 : i32, i32, i32
  }
  func.func @transform_11(%arg0: i32, %arg1: i32) -> (i32, i32, i32) {
    %c0_i32 = arith.constant 0 : i32
    %c0_i32_0 = arith.constant 0 : i32
    %c0_i32_1 = arith.constant 0 : i32
    return %arg1, %c0_i32, %c0_i32_0 : i32, i32, i32
  }
  func.func @transform_12(%arg0: i32, %arg1: i32) -> (i32, i32, i32) {
    %c0_i32 = arith.constant 0 : i32
    %c0_i32_0 = arith.constant 0 : i32
    %c0_i32_1 = arith.constant 0 : i32
    return %arg1, %c0_i32, %c0_i32_0 : i32, i32, i32
  }
  func.func @transform_13(%arg0: i32, %arg1: i32) -> (i32, i32, i32) {
    %c0_i32 = arith.constant 0 : i32
    %c0_i32_0 = arith.constant 0 : i32
    %c0_i32_1 = arith.constant 0 : i32
    return %arg1, %c0_i32, %c0_i32_0 : i32, i32, i32
  }
  func.func @transform_14(%arg0: i32, %arg1: i32) -> (i32, i32, i32) {
    %c0_i32 = arith.constant 0 : i32
    %c0_i32_0 = arith.constant 0 : i32
    %c0_i32_1 = arith.constant 0 : i32
    return %arg1, %c0_i32, %c0_i32_0 : i32, i32, i32
  }
  func.func @transform_15(%arg0: i32, %arg1: i32) -> (i32, i32, i32) {
    %c0_i32 = arith.constant 0 : i32
    %c0_i32_0 = arith.constant 0 : i32
    %c0_i32_1 = arith.constant 0 : i32
    return %arg1, %c0_i32, %c0_i32_0 : i32, i32, i32
  }
  func.func @transform_16(%arg0: i32, %arg1: i32) -> (i32, i32) {
    %c0_i32 = arith.constant 0 : i32
    %c0_i32_0 = arith.constant 0 : i32
    return %arg0, %c0_i32 : i32, i32
  }
}

</mosaic_0001>

<bundles_post_ra>
// kernel: tpu_custom_call.1
= control target key start
LH: loop header
LB: loop body
LE: loop exit
PB: predicated region body
PF: predicated region fallthrough
CT: control target
= control target key end

     0   :  { %s3062_s0 = inlined_call_operand.hbm [shape: f32[16,16], index: 0, kind: input, shape index: {}]   ;;  %s3063_s1 = inlined_call_operand.hbm [shape: f32[2,1,8], index: 1, kind: input, shape index: {}]   ;;  %s3064_s2 = inlined_call_operand.hbm [shape: bf16[16,32], index: 2, kind: input, shape index: {}]   ;;  %s3065_s3 = inlined_call_operand.hbm [shape: f32[1,32], index: 3, kind: input, shape index: {}]   ;;  %s3066_s4 = inlined_call_operand.vmem [shape: bf16[2,32,96], index: 4, kind: input, shape index: {}]   ;;  %s3067_s5 = inlined_call_operand.vmem [shape: f32[2,1,96], index: 5, kind: input, shape index: {}]   ;;  %s3068_s6 = inlined_call_operand.vmem [shape: bf16[2,32,32], index: 6, kind: input, shape index: {}]   ;;  %s3069_s7 = inlined_call_operand.vmem [shape: f32[2,1,32], index: 7, kind: input, shape index: {}]   ;;  %s3070_s8 = inlined_call_operand.vmem [shape: f32[2,1,32], index: 8, kind: input, shape index: {}]   ;;  %s3071_s9 = inlined_call_operand.vmem [shape: f32[2,1,32], index: 9, kind: input, shape index: {}]   ;;  %s3072_s10 = inlined_call_operand.vmem [shape: bf16[2,32,64], index: 10, kind: input, shape index: {}]   ;;  %s3073_s11 = inlined_call_operand.vmem [shape: f32[2,1,64], index: 11, kind: input, shape index: {}]   ;;  %s3074_s12 = inlined_call_operand.vmem [shape: bf16[2,64,32], index: 12, kind: input, shape index: {}]   ;;  %s3075_s13 = inlined_call_operand.vmem [shape: f32[2,1,32], index: 13, kind: input, shape index: {}]   ;;  %s3076_s14 = inlined_call_operand.vmem [shape: f32[2,1,32], index: 14, kind: input, shape index: {}]   ;;  %s3077_s15 = inlined_call_operand.vmem [shape: f32[2,1,32], index: 15, kind: input, shape index: {}]   ;;  %s3078_s16 = inlined_call_operand.hbm [shape: f32[16,32], index: 16, kind: output, shape index: {}]  }
   0x1   :  { %3093 = sst [smem:[#allocation30_spill]] %s3062_s0 }
   0x2   :  { %3094 = sst [smem:[#allocation31_spill]] %s3063_s1 }
   0x3   :  { %3095 = sst [smem:[#allocation32_spill]] %s3064_s2 }
   0x4   :  { %3096 = sst [smem:[#allocation33_spill]] %s3065_s3 }
   0x5   :  { %3097 = sst [smem:[#allocation34_spill]] %s3066_s4 }
   0x6   :  { %3098 = sst [smem:[#allocation35_spill]] %s3068_s6 }
   0x7   :  { %3099 = sst [smem:[#allocation36_spill]] %s3071_s9 }
   0x8   :  { %3100 = sst [smem:[#allocation37_spill]] %s3072_s10 }
   0x9   :  { %3101 = sst [smem:[#allocation38_spill]] %s3073_s11 }
   0xa   :  { %3102 = sst [smem:[#allocation39_spill]] %s3074_s12 }
   0xb   :  { %3103 = sst [smem:[#allocation40_spill]] %s3075_s13 }
   0xc   :  { %3104 = sst [smem:[#allocation41_spill]] %s3076_s14 }
   0xd   :  { %3105 = sst [smem:[#allocation42_spill]] %s3077_s15 }
   0xe   :  { %3106 = sst [smem:[#allocation43_spill]] %s3078_s16 }
   0xf   :  { %21 = vsyncpa [#allocation5], 0 }
  0x10   :  { %23 = vsyncpa [#allocation5 + $0x1], 0 }
  0x11   :  { %24 = vsyncpa [#allocation8], 0 }
  0x12   :  { %26 = vsyncpa [#allocation8 + $0x1], 0 }
  0x13   :  { %27 = vsyncpa [#allocation11], 0 }
  0x14   :  { %28 = vsyncpa [#allocation6], 0 }
  0x15   :  { %30 = vsyncpa [#allocation6 + $0x1], 0  ;;  %s2623_s21 = smov 0   ;;  %s2625_s22 = smov 0  }
  0x16   :  { %s2627_s23 = smov 0   ;;  %s2629_s24 = smov 0  }
  0x17   :  { %s2631_s25 = smov 0   ;;  %s2633_s26 = smov 0  }
  0x18   :  { %s2635_s27 = smov 0   ;;  %s2637_s28 = smov 0  }
  0x19 LB: > { %3107 = sst [smem:[#allocation18_spill]] %s2483_s21  ;;  %s2664_s29 = sadd.s32 4294967295, %s2511_s28   ;;  %s2511_s28 = sphi %s2637_s28, %s36_s28   ;;  %s2507_s27 = sphi %s2635_s27, %s3168_s27   ;;  %s2503_s26 = sphi %s2633_s26, %s3167_s26   ;;  %s2499_s25 = sphi %s2631_s25, %s3166_s25   ;;  %s2495_s24 = sphi %s2629_s24, %s3165_s24   ;;  %s2491_s23 = sphi %s2627_s23, %s3164_s23   ;;  %s2487_s22 = sphi %s2625_s22, %s3163_s22   ;;  %s2483_s21 = sphi %s2623_s21, %s3162_s21  }
  0x1a   : > { %3108 = sst [smem:[#allocation19_spill]] %s2487_s22  ;;  %s1952_s30 = sadd.s32 4294967294, %s2511_s28  }
  0x1b   : > { %3109 = sst [smem:[#allocation20_spill]] %s2491_s23  ;;  %p68_p0 = scmp.ne.s32.totalorder %s2487_s22, %s2483_s21 }
  0x1c   : > { %3110 = sst [smem:[#allocation21_spill]] %s2499_s25  ;;  %p3082_p1 = scmp.eq.s32.totalorder %s2664_s29, 0 }
  0x1d   : > { %3111 = sst [smem:[#allocation22_spill]] %s2503_s26  ;;  %p478_p3 = scmp.eq.s32.totalorder %s1952_s30, 3 }
  0x1e   : > { %3112 = sst [smem:[#allocation23_spill]] %s2507_s27  ;;  %p2673_p4 = por %p3082_p1, %p68_p0 }
  0x1f   : > { %3113 = sst [smem:[#allocation24_spill]] %s2511_s28  ;;  %p1953_p5 = scmp.ge.s32.totalorder %s2511_s28, 1 }
  0x20   : > { %p2678_p6 = por %p478_p3, %p68_p0  ;;  %p485_p7 = scmp.lt.s32.totalorder %s2511_s28, 5 }
  0x21   : > { %s2513_s19 = smov [#allocation9]   ;;  %s2514_s21 = smov [#allocation10]  }
  0x22   : > { %s3115_s17 = scalar_select %p2678_p6, 1, 0 }
  0x23   : > { %p2683_p8 = pnand %p1953_p5, %p485_p7  ;;  %s497_s20 = sshll.u32 %s2513_s19, 4  ;;  %s498_s20 = int_to_ptr.vmem [resolvable:$true] %s497_s20 }
  0x24   : > { %3116 = sst [smem:[#allocation25_spill]] %s3115_s17  ;;  %s511_s17 = sshll.u32 %s2514_s21, 4  ;;  %s512_s17 = int_to_ptr.vmem [resolvable:$true] %s511_s17 }
  0x25   : > { %p2153_p9 = pneg %p2683_p8  ;;  %s2306_s16 = scalar_lea.vmem %s498_s20, 128 }
  0x26   : > { %p2307_p12 = scmp.ne.s32.totalorder %s498_s20, %s2306_s16  ;;  %p2314_p3 = scmp.lt.s32.totalorder %s498_s20, %s498_s20 }
  0x27   : > { %p2691_p10 = pnand %p2153_p9, %p3082_p1  ;;  %p2315_p5 = scmp.lt.s32.totalorder %s2306_s16, %s2306_s16 }
  0x29   : > { %p2297_p11 = pneg %p2691_p10  ;;  %p2316_p7 = por %p2315_p5, %p2314_p3 }
  0x2b   : > { %p2309_p13 = pnand %p2307_p12, %p2297_p11 }
  0x2d   : > { %p2310_p0 = pneg %p2309_p13 }
  0x2f   : > { %p2317_p9 = pnand %p2316_p7, %p2310_p0 }
  0x31   : > { %2320 = shalt.err (!%p2317_p9)
}
  0x32   : > { %s2515_s19 = smov 64   ;;  %s2516_s25 = smov 4  }
  0x33   : > { %s3119_s2 = sld [smem:[#allocation32_spill]]  ;;  %s2332_s14 = scalar_lea.vmem %s512_s17, 16 }
  0x34   : > { %p2333_p1 = scmp.ne.s32.totalorder %s512_s17, %s2332_s14  ;;  %s2339_s13 = scalar_lea.vmem %s512_s17, 32 }
  0x35   : > { %p2340_p2 = scmp.lt.s32.totalorder %s512_s17, %s512_s17  ;;  %p2341_p3 = scmp.lt.s32.totalorder %s2339_s13, %s2332_s14 }
  0x36   : > { %p2335_p12 = pnand %p2333_p1, %p2297_p11 }
  0x37   : > { %p2342_p0 = por %p2341_p3, %p2340_p2 }
  0x38   : > { %p2336_p13 = pneg %p2335_p12 }
  0x39   : > { %2156 = dma.hbm_to_vmem [thread:$0]  (!%p2691_p10), %s3119_s2, 128, %s498_s20, [#allocation8], %s2515_s19, %s2515_s19, %s2516_s25  }
  0x3a   : > { %p2343_p5 = pnand %p2342_p0, %p2336_p13 }
  0x3c   : > { %2346 = shalt.err (!%p2343_p5)
}
  0x3d   : > { %s3120_s3 = sld [smem:[#allocation33_spill]]  ;;  %s45_s13 = sadd.s32 1, %s2503_s26 }
  0x3e   : > { %s48_s14 = sadd.s32 1, %s2507_s27  ;;  %p46_p1 = scmp.ge.s32.totalorder %s45_s13, 2 }
  0x3f   : > { %s55_s15 = sadd.s32 1, %s2491_s23  ;;  %p62_p2 = scmp.ne.s32.totalorder %s2491_s23, %s2487_s22 }
  0x40   : > { %p63_p11 = scmp.eq.s32.totalorder %s2511_s28, 0  ;;  %s3170_s13 = smov (%p46_p1, %s45_s13), 0 }
  0x41   : > { %3121 = sst [smem:[#allocation26_spill]] %s3170_s13  ;;  %s3172_s14 = smov (!%p46_p1, %s48_s14), %s2507_s27 }
  0x42   : > { %p2722_p7 = por %p63_p11, %p62_p2  ;;  %p3123_p9 = scmp.eq.s32.totalorder %s2664_s29, 3 }
  0x43   : > { %2159 = dma.hbm_to_vmem [thread:$0]  (!%p2691_p10), %s3120_s3, 16, %s512_s17, [#allocation11]  }
  0x44   : > { %p2728_p12 = por %p3123_p9, %p62_p2  ;;  %p50_p10 = scmp.ge.s32.totalorder %s3172_s14, 2 }
  0x45   : > { %p2173_p13 = scmp.lt.s32.totalorder %s2511_s28, 4  ;;  %s2734_s17 = sand.u32 1, %s2491_s23  }
  0x46   : > { %s3124_s25 = scalar_select %p2728_p12, 1, 0 }
  0x47   : > { %s1958_s20 = sshll.u32 %s2507_s27, 7  ;;  %s3174_s14 = smov (%p50_p10, %s3172_s14), 0 }
  0x48   : > { %3125 = sst [smem:[#allocation27_spill]] %s3124_s25  ;;  %s1957_s30 = sshll.u32 %s2734_s17, 3 }
  0x49   : > { %3126 = sst [smem:[#allocation28_spill]] %s3174_s14  ;;  %s52_s19 = ssub.s32 %s2507_s27, %s3174_s14 }
  0x4a   : > { %p53_p3 = scmp.eq.s32.totalorder %s52_s19, 0  ;;  %s3127_s2 = sld [smem:[#allocation30_spill]] }
  0x4b   : > { %s526_s13 = scalar_lea.vmem [#allocation4], %s1957_s30  ;;  %p2747_p0 = pnand %p2173_p13, %p2722_p7 }
  0x4c   : > { %s533_s26 = sshll.u32 %s526_s13, 4  ;;  %s523_s10 = scalar_lea.sflag [#allocation5], %s2734_s17  ;;  %s534_s26 = int_to_ptr.vmem [resolvable:$true] %s533_s26 }
  0x4d   : > { %s2752_s11 = scalar_select %p53_p3, %s2491_s23, %s55_s15  }
  0x4e   : > { %p2349_p5 = pneg %p2747_p0  ;;  %s2360_s19 = scalar_lea.vmem %s534_s26, 128 }
  0x4f   : > { %3129 = sst [smem:[#allocation29_spill]] %s2752_s11  ;;  %p2361_p1 = scmp.ne.s32.totalorder %s534_s26, %s2360_s19 }
  0x50   : > { %s531_s3 = scalar_lea.hbm %s3127_s2, %s1958_s20  ;;  %s2517_s2 = smov [#allocation4]  }
  0x51   : > { %p2363_p2 = pnand %p2361_p1, %p2349_p5  ;;  %s2365_s13 = sshll.u32 %s2517_s2, 4  ;;  %s2366_s13 = int_to_ptr.vmem [resolvable:$false] %s2365_s13 }
  0x52   : > { %s2367_s12 = scalar_lea.vmem %s2366_s13, 256  ;;  %p2368_p7 = scmp.lt.s32.totalorder %s534_s26, %s2366_s13 }
  0x53   : > { %p2364_p11 = pneg %p2363_p2  ;;  %p2369_p9 = scmp.lt.s32.totalorder %s2367_s12, %s2360_s19 }
  0x55   : > { %p2370_p10 = por %p2369_p9, %p2368_p7 }
  0x57   : > { %p2371_p13 = pnand %p2370_p10, %p2364_p11 }
  0x59   : > { %2374 = shalt.err (!%p2371_p13)
}
  0x5a   : > { %2163 = dma.hbm_to_vmem [thread:$0]  (!%p2747_p0), %s531_s3, 128, %s534_s26, %s523_s10  }
  0x5b   : > { %s540_s15 = sand.u32 1, %s2511_s28   ;;  %s1959_s20 = sshll.u32 %s2507_s27, 4 }
  0x5c   : > { %s3130_s1 = sld [smem:[#allocation31_spill]]  ;;  %s543_s2 = scalar_lea.vmem [#allocation7], %s2734_s17 }
  0x5d   : > { %s550_s14 = sshll.u32 %s543_s2, 4  ;;  %s541_s19 = scalar_lea.sflag [#allocation8], %s540_s15  ;;  %s551_s14 = int_to_ptr.vmem [resolvable:$true] %s550_s14 }
  0x5e   : > { %s2388_s13 = scalar_lea.vmem %s551_s14, 16  ;;  %s2518_s12 = smov [#allocation7]  }
  0x5f   : > { %p2389_p3 = scmp.ne.s32.totalorder %s551_s14, %s2388_s13  ;;  %s2393_s11 = sshll.u32 %s2518_s12, 4  ;;  %s2394_s11 = int_to_ptr.vmem [resolvable:$false] %s2393_s11 }
  0x60   : > { %s2395_s3 = scalar_lea.vmem %s2394_s11, 32  ;;  %p2396_p11 = scmp.lt.s32.totalorder %s551_s14, %s2394_s11 }
  0x61   : > { %p2391_p1 = pnand %p2389_p3, %p2349_p5  ;;  %p2397_p7 = scmp.lt.s32.totalorder %s2395_s3, %s2388_s13 }
  0x62   : > { %s548_s16 = scalar_lea.hbm %s3130_s1, %s1959_s20 }
  0x63   : > { %p2392_p2 = pneg %p2391_p1  ;;  %p2398_p9 = por %p2397_p7, %p2396_p11 }
  0x65   : > { %p2399_p10 = pnand %p2398_p9, %p2392_p2 }
  0x67   : > { %2402 = shalt.err (!%p2399_p10)
}
  0x68   : > { %2166 = dma.hbm_to_vmem [thread:$0]  (!%p2747_p0), %s548_s16, 16, %s551_s14, %s541_s19  }
  0x69   : > { %639 = sbr.rel (%p2683_p8) target bundleno = 2796 (0xaec), region = 84  ;;  %s2776_s10 = sand.u32 (!%p2683_p8), 1, %s2487_s22  }
  0x6a   : > { %s3087_s26 = sshll.u32 (!%p2683_p8), %s2776_s10, 3  ;;  %s642_s17 = scalar_lea.sflag (!%p2683_p8), [#allocation5], %s2776_s10 }
  0x6b   : > { %s2782_s11 = scalar_lea.vmem (!%p2683_p8), [#allocation4], %s3087_s26 }
  0x6e   : > { %2462 = dma.done.wait (%p2673_p4), %s642_s17, 128  }
  0x6f   : > { %2464 = vsyncadd (%p2673_p4), %s642_s17, 4294967168  ;;  %s650_s18 = sand.u32 1, %s2664_s29  }
  0x70   : > { %s651_s14 = scalar_lea.sflag [#allocation8], %s650_s18 }
  0x71   : > { %2466 = dma.done.wait (%p2673_p4), %s651_s14, 16  }
  0x72   : > { %2468 = vsyncadd (%p2673_p4), %s651_s14, 4294967280  ;;  %p3131_p8 = scmp.eq.s32.totalorder %s2664_s29, 0 }
  0x74   : > { %2470 = dma.done.wait (%p3131_p8), [#allocation8], 128   ;;  %p3132_p0 = pmov %p3131_p8 }
  0x76   : > { %2472 = vsyncadd (%p3132_p0), [#allocation8], 4294967168  ;;  %p3133_p5 = pmov %p3132_p0 }
  0x77   : > { %p3134_p13 = pmov %p3132_p0 }
  0x78   : > { %2474 = dma.done.wait (%p3133_p5), [#allocation11], 16  }
  0x79   : > { %2476 = vsyncadd (%p3134_p13), [#allocation11], 4294967280  ;;  %p758_p3 = scmp.lt.s32.totalorder %s2495_s24, 1  ;;  %s3135_s4 = sld [smem:[#allocation34_spill]] }
  0x7a   : > { %s3136_s6 = sld [smem:[#allocation35_spill]]  ;;  %s3144_s19 = sshll.u32 %s2776_s10, 3 }
  0x7b   : > { %s2804_s15 = scalar_select %p758_p3, %s2495_s24, 1 }
  0x7c   : > { %s3138_s1 = sld [smem:[#allocation37_spill]]  ;;  %p1973_p4 = scmp.ne.s32.totalorder %s2495_s24, 0 }
  0x7d   : > { %s2013_s0 = sshll.u32 %s2804_s15, 4  ;;  %s2016_s23 = sshll.u32 %s2804_s15, 5 }
  0x7e   : > { %s3140_s18 = sld [smem:[#allocation39_spill]] }
  0x7f   : > { %s2814_s2 = scalar_lea.vmem %s3135_s4, %s2013_s0  ;;  %s3141_s26 = sld [smem:[#allocation40_spill]] }
  0x80   : > { %s2819_s12 = scalar_lea.vmem %s3136_s6, %s2013_s0  ;;  %s3139_s6 = sld [smem:[#allocation38_spill]] }
  0x81   : > { %s3142_s28 = sld [smem:[#allocation41_spill]] }
  0x82   : > { %s2836_s4 = scalar_lea.vmem %s3138_s1, %s2013_s0  ;;  %s3143_s16 = sld [smem:[#allocation42_spill]] }
  0x84   : > { %s2846_s22 = scalar_lea.vmem %s3140_s18, %s2016_s23  ;;  %806 = sbr.rel (%p1973_p4) target bundleno = 341 (0x155), region = 104 }
  0x85   : > { %s795_s20 = scalar_lea.vmem %s3141_s26, %s2804_s15 }
  0x86   : > { %s787_s27 = scalar_lea.vmem %s3139_s6, %s2804_s15  ;;  %s2862_s6 = scalar_lea.vmem [#allocation12], %s3144_s19 }
  0x87   : > { %s798_s21 = scalar_lea.vmem %s3142_s28, %s2804_s15 }
  0x88   : > { %s801_s9 = scalar_lea.vmem %s3143_s16, %s2804_s15 }
  0x89   : > { %v2263_v0 = vld [vmem:[#allocation9] sm:$0xff]   ;;  %v2519_v1 = vmov 0.0   ;;  %v807_v2 = vld [vmem:[%s2782_s11] sm:$0xff]  ;;  %vm2520_vm0 = vmmov 0   ;;  %vm824_vm1 = vcmask 130048   ;;  %vm868_vm2 = vcmask 261120  }
  0x8a   : > { %2049 = vmatprep.subr.bf16.mxu0 %v2519_v1  ;;  %2051 = vmatprep.mubr.msk.bf16.mxu0 %vm2520_vm0, %v2519_v1  ;;  %v808_v3 = vpack.c.bf16 %v807_v2, %v807_v2  ;;  %v1974_v4 = vld [vmem:[#allocation10] ss:$0 sm:$0xff] }
  0x8b   : > { %2050 = vmatpush3.bf16.msra.mxu0 %v2263_v0 }
  0x8e   : > { %2052 = vmatmul.mubr.msk.bf16.vlgmr.msra.gmra.mxu0 %vm824_vm1, %v808_v3 }
 0x14e   : > { %v862_v5 = vpop.f32.mrf.mxu0 }
 0x14f   : > { %v863_v6 = vadd.f32 %v1974_v4, %v862_v5 }
 0x150   : > { %v2053_v7 = vpop.f32.mrf.mxu0 }
 0x151   : > { %869 = vst.msk [vmem:[%s2862_s6] sm:$0xff] %vm868_vm2, %v863_v6 }
 0x152   : > { %v865_v8 = vpop.f32.mrf.mxu0 }
 0x154   : > { %v2054_v9 = vpop.f32.mrf.mxu0 }
 0x155 PF: > { %v2264_v10 = vld [vmem:[%s2814_s2 + $0x8] sm:$0xff]   ;;  %v2521_v11 = vmov 0.0   ;;  %v2265_v12 = vld [vmem:[%s2814_s2] sm:$0xff]   ;;  %vm2522_vm3 = vmmov 0   ;;  %vm895_vm4 = vcmask 261120   ;;  %s3145_s28 = scalar_lea.vmem %s3067_s5, %s2804_s15  ;;  %vm941_vm5 = vcmask 257024   ;;  %s3147_s24 = scalar_lea.vmem %s3069_s7, %s2804_s15 }
 0x156   : > { %2055 = vmatprep.subr.bf16.mxu0 %v2521_v11  ;;  %2063 = vmatprep.subr.bf16.mxu1 %v2521_v11  ;;  %v1977_v15 = vld [vmem:[%s3145_s28] ss:$0 sm:$0xff]  ;;  %vm944_vm6 = vcmask 781568   ;;  %s2523_s26 = smov 120   ;;  %s2524_s11 = smov 96   ;;  %vm959_vm7 = vcmask 64512  }
 0x157   : > { %2056 = vmatpush3.bf16.msra.mxu0 %v2264_v10  ;;  %2059 = vmatprep.mubr.msk.bf16.mxu0 %vm2522_vm3, %v2521_v11  ;;  %s2525_s30 = smov 80   ;;  %s2526_s2 = smov 88   ;;  %vm1023_vm8 = vcmask 1043456   ;;  %vm1410_vm9 = vcmask 130048   ;;  %vm1412_vm10 = vcmask 195584   ;;  %vm1622_vm11 = vcmask 523264  }
 0x158   : > { %v2874_v13 = vld [vmem:[%s2862_s6] sm:$0xff]  ;;  %2057 = vmatprep.subr.bf16.mxu0 %v2521_v11  ;;  %2065 = vmatprep.mubr.msk.bf16.mxu1 %vm2522_vm3, %v2521_v11  ;;  %s2527_s18 = smov 72   ;;  %s2528_s13 = smov 112  }
 0x159   : > { %v871_v14 = vpack.c.bf16 %v2874_v13, %v2874_v13  ;;  %s2529_s3 = smov 104   ;;  %s3146_s17 = scalar_lea.vmem [#allocation7], %s2776_s10 }
 0x15a   : > { %v1981_v37 = vld [vmem:[%s3146_s17] ss:$0 sm:$0xff]  ;;  %s2530_s25 = smov 56   ;;  %s2531_s14 = smov 64  }
 0x15b   : > { %2058 = vmatpush3.bf16.msra.mxu0 %v2265_v12  ;;  %s2532_s29 = smov 40   ;;  %s2533_s1 = smov 48  }
 0x15c   : > { %2069 = vmatprep.subr.bf16.mxu0 %v2521_v11  ;;  %s2534_s0 = smov 8   ;;  %s2535_s16 = smov 16  }
 0x15d   : > { %s2536_s19 = smov 24  }
 0x15e   : > { %2060 = vmatmul.mubr.msk.bf16.vlgmr.msra.gmra.mxu0 %vm895_vm4, %v871_v14 }
 0x15f   : > { %2071 = vmatprep.mubr.msk.bf16.mxu0 %vm2522_vm3, %v2521_v11 }
 0x21e   : > { %v933_v16 = vpop.f32.mrf.mxu0 }
 0x21f   : > { %v934_v17 = vadd.f32 %v1977_v15, %v933_v16 }
 0x220   : > { %v2061_v18 = vpop.f32.mrf.mxu0 }
 0x221   : > { %v939_v19 = vmul.f32 0.35355338, %v934_v17  ;;  %v943_v22 = vpack.c.bf16 %v934_v17, %v934_v17 }
 0x222   : > { %v936_v20 = vpop.f32.mrf.mxu0 }
 0x223   : > { %v940_v21 = vpack.c.bf16 %v939_v19, %v939_v19 }
 0x224   : > { %v2062_v23 = vpop.f32.mrf.mxu0 }
 0x225   : > { %942 = vst.msk [vmem:[#allocation2] sm:$0xf] %vm941_vm5, %v940_v21 }
 0x226   : > { %945 = vst.msk [vmem:[#allocation2] sm:$0xf] %vm944_vm6, %v943_v22 }
 0x22d   : > { %v947_v24 = vld [vmem:[#allocation2] sm:$0xf] }
 0x22e   : > { %v2891_v25 = vcombine.low %v947_v24, %v947_v24 }
 0x230   : > { %1067 = vrot.lane.b32.xlu1 %v2891_v25, %s2523_s26  ;;  %957 = vrot.lane.b32.xlu0 %v2891_v25, %s2524_s11  ;;  %s3148_s26 = scalar_lea.vmem %s3070_s8, %s2804_s15 }
 0x234   : > { %1179 = vrot.lane.b32.xlu1 %v2891_v25, %s2525_s30  ;;  %1069 = vrot.lane.b32.xlu0 %v2891_v25, %s2526_s2  ;;  %s3149_s2 = sld [smem:[#allocation36_spill]] }
 0x238   : > { %1289 = vrot.lane.b32.xlu1 %v2891_v25, %s2527_s18  ;;  %1177 = vrot.lane.b32.xlu0 %v2891_v25, %s2528_s13 }
 0x23a   : > { %s3150_s18 = scalar_lea.vmem %s3149_s2, %s2804_s15  ;;  %s1698_s2 = scalar_lea.sflag [#allocation6], %s2776_s10 }
 0x23c   : > { %1287 = vrot.lane.b32.xlu0 %v2891_v25, %s2529_s3 }
 0x2a2   : > { %v958_v26 = vpop.permute.xlu0 %957  ;;  %v1068_v29 = vpop.permute.xlu1 %1067 }
 0x2a3   : > { %v964_v27 = vsel %vm959_vm7, %v958_v26, 0 }
 0x2a4   : > { %2064 = vmatpush3.bf16.xpose.msra.mxu1 %v964_v27 }
 0x2a5   : > { %2075 = vmatprep.subr.bf16.mxu1 %v2521_v11 }
 0x2a6   : > { %v1070_v28 = vpop.permute.xlu0 %1069  ;;  %v1180_v31 = vpop.permute.xlu1 %1179 }
 0x2a7   : > { %v1075_v30 = vsel %vm959_vm7, %v1070_v28, 0  ;;  %v1185_v32 = vsel %vm959_vm7, %v1180_v31, 0 }
 0x2aa   : > { %v1290_v33 = vpop.permute.xlu1 %1289  ;;  %v1178_v34 = vpop.permute.xlu0 %1177 }
 0x2ab   : > { %2066 = vmatmul.mubr.msk.bf16.vlgmr.msra.gmra.mxu1 %vm959_vm7, %v947_v24  ;;  %v1295_v35 = vsel %vm959_vm7, %v1290_v33, 0 }
 0x2ac   : > { %2076 = vmatpush3.bf16.xpose.msra.mxu1 %v1075_v30  ;;  %2077 = vmatprep.mubr.msk.bf16.mxu1 %vm2522_vm3, %v2521_v11 }
 0x2ad   : > { %2087 = vmatprep.subr.bf16.mxu1 %v2521_v11 }
 0x2ae   : > { %v1288_v36 = vpop.permute.xlu0 %1287 }
 0x2b3   : > { %2078 = vmatmul.mubr.msk.bf16.vlgmr.msra.gmra.mxu1 %vm959_vm7, %v1068_v29 }
 0x2b4   : > { %2088 = vmatpush3.bf16.xpose.msra.mxu1 %v1185_v32  ;;  %2089 = vmatprep.mubr.msk.bf16.mxu1 %vm2522_vm3, %v2521_v11 }
 0x2b5   : > { %2099 = vmatprep.subr.bf16.mxu1 %v2521_v11 }
 0x2bb   : > { %2090 = vmatmul.mubr.msk.bf16.vlgmr.msra.gmra.mxu1 %vm959_vm7, %v1178_v34 }
 0x2bc   : > { %2100 = vmatpush3.bf16.xpose.msra.mxu1 %v1295_v35  ;;  %2101 = vmatprep.mubr.msk.bf16.mxu1 %vm2522_vm3, %v2521_v11 }
 0x2bd   : > { %2111 = vmatprep.subr.bf16.mxu1 %v2521_v11 }
 0x2c3   : > { %2102 = vmatmul.mubr.msk.bf16.vlgmr.msra.gmra.mxu1 %vm959_vm7, %v1288_v36 }
 0x2c4   : > { %2115 = vmatprep.mubr.msk.bf16.mxu1 %vm2522_vm3, %v2521_v11 }
 0x36b   : > { %v1000_v38 = vpop.f32.mrf.mxu1 }
 0x36c   : > { %v1001_v39 = vadd.f32 %v1981_v37, %v1000_v38 }
 0x36d   : > { %v2067_v40 = vpop.f32.mrf.mxu1 }
 0x36e   : > { %v1006_v41 = vsel %vm959_vm7, %v1001_v39, -inf }
 0x36f   : > { %1007 = vmax.xlane.f32.xlu1 %v1006_v41  ;;  %v1003_v42 = vpop.f32.mrf.mxu1 }
 0x371   : > { %v2068_v43 = vpop.f32.mrf.mxu1 }
 0x373   : > { %v1111_v44 = vpop.f32.mrf.mxu1 }
 0x374   : > { %v1112_v45 = vadd.f32 %v1981_v37, %v1111_v44 }
 0x375   : > { %v2079_v46 = vpop.f32.mrf.mxu1 }
 0x376   : > { %v1117_v47 = vsel %vm959_vm7, %v1112_v45, -inf }
 0x377   : > { %1118 = vmax.xlane.f32.xlu0 %v1117_v47  ;;  %v1114_v48 = vpop.f32.mrf.mxu1 }
 0x379   : > { %v2080_v49 = vpop.f32.mrf.mxu1 }
 0x37b   : > { %v1221_v50 = vpop.f32.mrf.mxu1 }
 0x37c   : > { %v1222_v51 = vadd.f32 %v1981_v37, %v1221_v50 }
 0x37d   : > { %v2091_v52 = vpop.f32.mrf.mxu1 }
 0x37e   : > { %v1227_v53 = vsel %vm959_vm7, %v1222_v51, -inf }
 0x37f   : > { %1228 = vmax.xlane.f32.xlu0 %v1227_v53  ;;  %v1224_v54 = vpop.f32.mrf.mxu1  ;;  %v2267_v53 = vld [vmem:[%s2819_s12 + $0x8] sm:$0xff]  }
 0x380   : > { %2112 = vmatpush3.bf16.msra.mxu1 %v2267_v53 }
 0x381   : > { %v2092_v55 = vpop.f32.mrf.mxu1  ;;  %2113 = vmatprep.subr.bf16.mxu1 %v2521_v11 }
 0x382   : > { %v2268_v55 = vld [vmem:[%s2819_s12] sm:$0xff]  }
 0x383   : > { %v1331_v56 = vpop.f32.mrf.mxu1 }
 0x384   : > { %v1332_v57 = vadd.f32 %v1981_v37, %v1331_v56  ;;  %2114 = vmatpush3.bf16.msra.mxu1 %v2268_v55 }
 0x385   : > { %v2103_v58 = vpop.f32.mrf.mxu1  ;;  %2127 = vmatprep.subr.bf16.mxu1 %v2521_v11 }
 0x386   : > { %v1337_v59 = vsel %vm959_vm7, %v1332_v57, -inf }
 0x387   : > { %1338 = vmax.xlane.f32.xlu1 %v1337_v59  ;;  %v1334_v60 = vpop.f32.mrf.mxu1 }
 0x389   : > { %v2104_v61 = vpop.f32.mrf.mxu1 }
 0x3f8   : > { %v1008_v62 = vpop.xlane.xlu1 %1007 }
 0x3f9   : > { %v1009_v63 = vsub.f32 %v1001_v39, %v1008_v62 }
 0x3fb   : > { %v1010_v0 = vmul.f32 1.442695, %v1009_v63 }
 0x3fd   : > { %2275 = vpow2.f32 %v1010_v0 }
 0x400   : > { %v1119_v1 = vpop.xlane.xlu0 %1118 }
 0x401   : > { %v1120_v2 = vsub.f32 %v1112_v45, %v1119_v1 }
 0x403   : > { %v1121_v3 = vmul.f32 1.442695, %v1120_v2 }
 0x405   : > { %2277 = vpow2.f32 %v1121_v3 }
 0x408   : > { %v1229_v4 = vpop.xlane.xlu0 %1228 }
 0x409   : > { %v1230_v5 = vsub.f32 %v1222_v51, %v1229_v4 }
 0x40a   : > { %v2276_v6 = vpop.eup %2275 }
 0x40b   : > { %v1231_v7 = vmul.f32 1.442695, %v1230_v5  ;;  %v1012_v8 = vsel %vm959_vm7, %v2276_v6, 0.0 }
 0x40c   : > { %1013 = vadd.xlane.f32.xlu0 %v1012_v8 }
 0x40d   : > { %2279 = vpow2.f32 %v1231_v7 }
 0x410   : > { %v1339_v15 = vpop.xlane.xlu1 %1338 }
 0x411   : > { %v1340_v16 = vsub.f32 %v1332_v57, %v1339_v15 }
 0x412   : > { %v2278_v9 = vpop.eup %2277 }
 0x413   : > { %v1123_v10 = vsel %vm959_vm7, %v2278_v9, 0.0  ;;  %v1341_v17 = vmul.f32 1.442695, %v1340_v16 }
 0x414   : > { %1124 = vadd.xlane.f32.xlu1 %v1123_v10 }
 0x415   : > { %2281 = vpow2.f32 %v1341_v17 }
 0x41a   : > { %v2280_v12 = vpop.eup %2279 }
 0x41b   : > { %v1233_v14 = vsel %vm959_vm7, %v2280_v12, 0.0 }
 0x41c   : > { %1234 = vadd.xlane.f32.xlu0 %v1233_v14 }
 0x422   : > { %v2282_v18 = vpop.eup %2281 }
 0x423   : > { %v1343_v19 = vsel %vm959_vm7, %v2282_v18, 0.0 }
 0x425   : > { %1129 = vrot.lane.b32.xlu1 %v2891_v25, %s2530_s25 }
 0x432   : > { %1018 = vrot.lane.b32.xlu0 %v2891_v25, %s2531_s14 }
 0x436   : > { %1349 = vrot.lane.b32.xlu0 %v2891_v25, %s2532_s29 }
 0x449   : > { %1344 = vadd.xlane.f32.xlu1 %v1343_v19 }
 0x45a   : > { %1239 = vrot.lane.b32.xlu1 %v2891_v25, %s2533_s1 }
 0x495   : > { %v1014_v20 = vpop.xlane.xlu0 %1013 }
 0x496   : > { %2283 = vrcp.f32 %v1014_v20 }
 0x49d   : > { %v1125_v21 = vpop.xlane.xlu1 %1124 }
 0x49e   : > { %2285 = vrcp.f32 %v1125_v21  ;;  %v2269_v21 = vld [vmem:[%s2836_s4 + $0x8] sm:$0xff]  }
 0x4a1   : > { %v1130_v28 = vpop.permute.xlu1 %1129 }
 0x4a2   : > { %v1135_v31 = vsel %vm1023_vm8, %v1130_v28, 0 }
 0x4a3   : > { %v2284_v22 = vpop.eup %2283 }
 0x4a4   : > { %v1016_v24 = vmul.f32 %v2284_v22, %v2276_v6  ;;  %v1991_v6 = vld [vmem:[%s3147_s24] ss:$0 sm:$0xff]  ;;  %s1711_s24 = sshll.u32 %s2862_s6, 4  ;;  %s1712_s24 = int_to_ptr.vmem [resolvable:$true] %s1711_s24 }
 0x4a5   : > { %v1235_v23 = vpop.xlane.xlu0 %1234  ;;  %v2270_v22 = vld [vmem:[%s2836_s4] sm:$0xff]  }
 0x4a6   : > { %v1017_v29 = vpack.c.bf16 %v1016_v24, %v1016_v24  ;;  %2287 = vrcp.f32 %v1235_v23  ;;  %v2272_v23 = vld [vmem:[%s2846_s22 + $0x10] sm:$0xff]  }
 0x4a9   : > { %v1019_v26 = vpop.permute.xlu0 %1018 }
 0x4aa   : > { %v1025_v27 = vsel %vm1023_vm8, %v1019_v26, 0 }
 0x4ab   : > { %2070 = vmatpush3.bf16.msra.mxu0 %v1025_v27  ;;  %v2286_v30 = vpop.eup %2285 }
 0x4ac   : > { %2081 = vmatprep.subr.bf16.mxu0 %v2521_v11  ;;  %v1127_v25 = vmul.f32 %v2286_v30, %v2278_v9 }
 0x4ad   : > { %v1350_v38 = vpop.permute.xlu0 %1349 }
 0x4ae   : > { %2072 = vmatmul.mubr.msk.bf16.vlgmr.msra.gmra.mxu0 %vm959_vm7, %v1017_v29  ;;  %v1128_v32 = vpack.c.bf16 %v1127_v25, %v1127_v25  ;;  %v1355_v40 = vsel %vm1023_vm8, %v1350_v38, 0  ;;  %v1995_v29 = vld [vmem:[%s3148_s26] ss:$0 sm:$0xff]  ;;  %s3157_s26 = sld [smem:[#allocation43_spill]] }
 0x4af   : > { %2082 = vmatpush3.bf16.msra.mxu0 %v1135_v31  ;;  %2083 = vmatprep.mubr.msk.bf16.mxu0 %vm2522_vm3, %v2521_v11  ;;  %v1996_v31 = vld [vmem:[%s3150_s18] ss:$0 sm:$0xff]  ;;  %s2403_s18 = scalar_lea.vmem %s1712_s24, 128 }
 0x4b0   : > { %2093 = vmatprep.subr.bf16.mxu0 %v2521_v11  ;;  %p2404_p1 = scmp.ne.s32.totalorder %s1712_s24, %s2403_s18 }
 0x4b2   : > { %p2405_p2 = pnand %p2404_p1, %p2728_p12 }
 0x4b3   : > { %v2288_v33 = vpop.eup %2287 }
 0x4b4   : > { %v1237_v35 = vmul.f32 %v2288_v33, %v2280_v12  ;;  %s3158_s11 = smov %s3157_s26  ;;  %p2406_p11 = pneg %p2405_p2 }
 0x4b6   : > { %2084 = vmatmul.mubr.msk.bf16.vlgmr.msra.gmra.mxu0 %vm959_vm7, %v1128_v32  ;;  %v1238_v39 = vpack.c.bf16 %v1237_v35, %v1237_v35  ;;  %v2274_v35 = vld [vmem:[%s2846_s22] sm:$0xff]  }
 0x4b7   : > { %2095 = vmatprep.mubr.msk.bf16.mxu0 %vm2522_vm3, %v2521_v11 }
 0x4d2   : > { %v1345_v34 = vpop.xlane.xlu1 %1344 }
 0x4d3   : > { %2289 = vrcp.f32 %v1345_v34  ;;  %v2273_v34 = vld [vmem:[%s2846_s22 + $0x8] sm:$0xff]  }
 0x4d6   : > { %v1240_v36 = vpop.permute.xlu1 %1239 }
 0x4d7   : > { %v1245_v37 = vsel %vm1023_vm8, %v1240_v36, 0  ;;  %v1997_v36 = vld [vmem:[%s787_s27] ss:$0 sm:$0xff] }
 0x4d8   : > { %2094 = vmatpush3.bf16.msra.mxu0 %v1245_v37 }
 0x4d9   : > { %2105 = vmatprep.subr.bf16.mxu0 %v2521_v11 }
 0x4db   : > { %2096 = vmatmul.mubr.msk.bf16.vlgmr.msra.gmra.mxu0 %vm959_vm7, %v1238_v39 }
 0x4dc   : > { %2106 = vmatpush3.bf16.msra.mxu0 %v1355_v40  ;;  %2107 = vmatprep.mubr.msk.bf16.mxu0 %vm2522_vm3, %v2521_v11 }
 0x4dd   : > { %2119 = vmatprep.subr.bf16.mxu0 %v2521_v11 }
 0x4e0   : > { %v2290_v41 = vpop.eup %2289 }
 0x4e1   : > { %v1347_v42 = vmul.f32 %v2290_v41, %v2282_v18 }
 0x4e3   : > { %v1348_v43 = vpack.c.bf16 %v1347_v42, %v1347_v42 }
 0x4e5   : > { %2108 = vmatmul.mubr.msk.bf16.vlgmr.msra.gmra.mxu0 %vm959_vm7, %v1348_v43 }
 0x4e6   : > { %2123 = vmatprep.mubr.msk.bf16.mxu0 %vm2522_vm3, %v2521_v11  ;;  %2120 = vmatpush3.bf16.msra.mxu0 %v2269_v21 }
 0x4e7   : > { %2121 = vmatprep.subr.bf16.mxu0 %v2521_v11 }
 0x4ea   : > { %2122 = vmatpush3.bf16.msra.mxu0 %v2270_v22 }
 0x56e   : > { %v1061_v44 = vpop.f32.mrf.mxu0 }
 0x570   : > { %v2073_v45 = vpop.f32.mrf.mxu0 }
 0x572   : > { %v1064_v46 = vpop.f32.mrf.mxu0 }
 0x574   : > { %v2074_v47 = vpop.f32.mrf.mxu0 }
 0x576   : > { %v1171_v48 = vpop.f32.mrf.mxu0 }
 0x577   : > { %1398 = vrot.lane.b32.xlu1 %v1171_v48, %s2534_s0 }
 0x578   : > { %v2085_v49 = vpop.f32.mrf.mxu0 }
 0x57a   : > { %v1174_v50 = vpop.f32.mrf.mxu0 }
 0x57c   : > { %v2086_v51 = vpop.f32.mrf.mxu0 }
 0x59b   : > { %v1281_v52 = vpop.f32.mrf.mxu0 }
 0x59c   : > { %1402 = vrot.lane.b32.xlu0 %v1281_v52, %s2535_s16 }
 0x59d   : > { %v2097_v54 = vpop.f32.mrf.mxu0 }
 0x59f   : > { %v1284_v56 = vpop.f32.mrf.mxu0 }
 0x5a1   : > { %v2098_v57 = vpop.f32.mrf.mxu0 }
 0x5a5   : > { %v1391_v58 = vpop.f32.mrf.mxu0 }
 0x5a6   : > { %1406 = vrot.lane.b32.xlu1 %v1391_v58, %s2536_s19 }
 0x5a7   : > { %v2109_v59 = vpop.f32.mrf.mxu0 }
 0x5a9   : > { %v1394_v60 = vpop.f32.mrf.mxu0 }
 0x5aa   : > { %v2007_v60 = vld [vmem:[%s798_s21] ss:$0 sm:$0xff]  ;;  %s2537_s21 = smov [#allocation12]  }
 0x5ab   : > { %v2110_v61 = vpop.f32.mrf.mxu0  ;;  %s2407_s15 = sshll.u32 %s2537_s21, 4  ;;  %s2408_s15 = int_to_ptr.vmem [resolvable:$false] %s2407_s15 }
 0x5ac   : > { %p2410_p7 = scmp.lt.s32.totalorder %s1712_s24, %s2408_s15 }
 0x5e9   : > { %v1399_v62 = vpop.permute.xlu1 %1398 }
 0x5ea   : > { %v1409_v0 = vsel %vm959_vm7, %v1061_v44, %v1399_v62  ;;  %v2008_v62 = vld [vmem:[%s801_s9] ss:$0 sm:$0xff]  ;;  %s2409_s9 = scalar_lea.vmem %s2408_s15, 256 }
 0x5eb   : > { %p2411_p9 = scmp.lt.s32.totalorder %s2409_s9, %s2403_s18 }
 0x5ed   : > { %p2412_p10 = por %p2411_p9, %p2410_p7 }
 0x5ef   : > { %p2413_p8 = pnand %p2412_p10, %p2406_p11 }
 0x60e   : > { %v1403_v63 = vpop.permute.xlu0 %1402 }
 0x60f   : > { %v1411_v1 = vsel %vm1410_vm9, %v1409_v0, %v1403_v63 }
 0x618   : > { %v1407_v2 = vpop.permute.xlu1 %1406 }
 0x619   : > { %v1413_v3 = vsel %vm1412_vm10, %v1411_v1, %v1407_v2 }
 0x61a   : > { %v1414_v4 = vpack.c.bf16 %v1413_v3, %v1413_v3 }
 0x61c   : > { %1415 = vst.msk [vmem:[#allocation3] sm:$0xf] %vm941_vm5, %v1414_v4 }
 0x623   : > { %v1416_v5 = vld [vmem:[#allocation3] sm:$0xf] }
 0x624   : > { %2116 = vmatmul.mubr.msk.bf16.vlgmr.msra.gmra.mxu1 %vm895_vm4, %v1416_v5 }
 0x625   : > { %2135 = vmatprep.mubr.msk.bf16.mxu1 %vm2522_vm3, %v2521_v11 }
 0x6e4   : > { %v1477_v7 = vpop.f32.mrf.mxu1 }
 0x6e5   : > { %v1478_v8 = vadd.f32 %v1991_v6, %v1477_v7 }
 0x6e6   : > { %v2117_v9 = vpop.f32.mrf.mxu1 }
 0x6e7   : > { %v1483_v10 = vadd.f32 %v1478_v8, %v2874_v13  ;;  %v2271_v13 = vld [vmem:[%s2846_s22 + $0x18] sm:$0xff]   ;;  %s3153_s22 = sld [smem:[#allocation21_spill]] }
 0x6e8   : > { %v1480_v12 = vpop.f32.mrf.mxu1  ;;  %2128 = vmatpush3.bf16.msra.mxu1 %v2271_v13 }
 0x6e9   : > { %v1486_v14 = vsel %vm895_vm4, %v1483_v10, 0.0  ;;  %2129 = vmatprep.subr.bf16.mxu1 %v2521_v11 }
 0x6ea   : > { %1487 = vadd.xlane.f32.xlu0 %v1486_v14  ;;  %v2118_v15 = vpop.f32.mrf.mxu1 }
 0x6ec   : > { %2130 = vmatpush3.bf16.msra.mxu1 %v2272_v23 }
 0x6ed   : > { %2131 = vmatprep.subr.bf16.mxu1 %v2521_v11  ;;  %s2010_s23 = sshll.u32 %s3153_s22, 7 }
 0x6ee   : > { %s1709_s30 = scalar_lea.hbm %s3157_s26, %s2010_s23 }
 0x6f0   : > { %2132 = vmatpush3.bf16.msra.mxu1 %v2273_v34 }
 0x6f1   : > { %2133 = vmatprep.subr.bf16.mxu1 %v2521_v11  ;;  %v2001_v11 = vld [vmem:[%s795_s20] ss:$0 sm:$0xff] }
 0x6f4   : > { %2134 = vmatpush3.bf16.msra.mxu1 %v2274_v35 }
 0x773   : > { %v1488_v16 = vpop.xlane.xlu0 %1487 }
 0x774   : > { %v1490_v17 = vmul.f32 0.03125, %v1488_v16 }
 0x776   : > { %v1491_v18 = vsub.f32 %v1483_v10, %v1490_v17 }
 0x778   : > { %v1492_v19 = vmul.f32 %v1491_v18, %v1491_v18 }
 0x77a   : > { %v1493_v20 = vsel %vm895_vm4, %v1492_v19, 0.0 }
 0x77b   : > { %1494 = vadd.xlane.f32.xlu1 %v1493_v20 }
 0x804   : > { %v1495_v24 = vpop.xlane.xlu1 %1494 }
 0x805   : > { %v1496_v26 = vmul.f32 0.03125, %v1495_v24 }
 0x807   : > { %v1497_v27 = vadd.f32 1e-05, %v1496_v26 }
 0x809   : > { %2291 = vrsqrt.f32 %v1497_v27 }
 0x816   : > { %v2292_v28 = vpop.eup %2291 }
 0x817   : > { %v1499_v30 = vmul.f32 %v2292_v28, %v1491_v18 }
 0x819   : > { %v1506_v25 = vmul.f32 %v1995_v29, %v1499_v30 }
 0x81b   : > { %v1513_v32 = vadd.f32 %v1996_v31, %v1506_v25 }
 0x81d   : > { %v1514_v33 = vpack.c.bf16 %v1513_v32, %v1513_v32 }
 0x81f   : > { %2124 = vmatmul.mubr.msk.bf16.vlgmr.msra.gmra.mxu0 %vm895_vm4, %v1514_v33 }
 0x8df   : > { %v1575_v37 = vpop.f32.mrf.mxu0 }
 0x8e0   : > { %v1576_v38 = vadd.f32 %v1997_v36, %v1575_v37 }
 0x8e1   : > { %v2125_v39 = vpop.f32.mrf.mxu0 }
 0x8e2   : > { %v1581_v40 = vmax.f32 %v1576_v38, 0.0 }
 0x8e3   : > { %v1578_v41 = vpop.f32.mrf.mxu0 }
 0x8e4   : > { %v1582_v42 = vpack.c.bf16 %v1581_v40, %v1581_v40 }
 0x8e5   : > { %v2126_v43 = vpop.f32.mrf.mxu0 }
 0x8e6   : > { %2136 = vmatmul.mubr.msk.bf16.vlgmr.msra.gmra.mxu1 %vm1622_vm11, %v1582_v42 }
 0x9a6   : > { %v1660_v44 = vpop.f32.mrf.mxu1 }
 0x9a7   : > { %v1661_v45 = vadd.f32 %v2001_v11, %v1660_v44 }
 0x9a8   : > { %v2137_v46 = vpop.f32.mrf.mxu1 }
 0x9a9   : > { %v1666_v47 = vadd.f32 %v1661_v45, %v1513_v32 }
 0x9aa   : > { %v1663_v48 = vpop.f32.mrf.mxu1 }
 0x9ab   : > { %v1669_v49 = vsel %vm895_vm4, %v1666_v47, 0.0 }
 0x9ac   : > { %1670 = vadd.xlane.f32.xlu0 %v1669_v49  ;;  %v2138_v50 = vpop.f32.mrf.mxu1 }
 0xa35   : > { %v1671_v51 = vpop.xlane.xlu0 %1670 }
 0xa36   : > { %v1672_v52 = vmul.f32 0.03125, %v1671_v51 }
 0xa38   : > { %v1673_v53 = vsub.f32 %v1666_v47, %v1672_v52 }
 0xa3a   : > { %v1674_v54 = vmul.f32 %v1673_v53, %v1673_v53 }
 0xa3c   : > { %v1675_v55 = vsel %vm895_vm4, %v1674_v54, 0.0 }
 0xa3d   : > { %1676 = vadd.xlane.f32.xlu0 %v1675_v55 }
 0xac6   : > { %v1677_v56 = vpop.xlane.xlu0 %1676 }
 0xac7   : > { %v1678_v57 = vmul.f32 0.03125, %v1677_v56 }
 0xac9   : > { %v1679_v58 = vadd.f32 1e-05, %v1678_v57 }
 0xacb   : > { %2293 = vrsqrt.f32 %v1679_v58 }
 0xad8   : > { %v2294_v59 = vpop.eup %2293 }
 0xad9   : > { %v1681_v61 = vmul.f32 %v2294_v59, %v1673_v53 }
 0xadb   : > { %v1688_v63 = vmul.f32 %v2007_v60, %v1681_v61 }
 0xadd   : > { %v1695_v0 = vadd.f32 %v2008_v62, %v1688_v63 }
 0xadf   : > { %1696 = vst.msk [vmem:[%s2862_s6] sm:$0xff] %vm895_vm4, %v1695_v0 }
 0xae0   : > { %2416 = shalt.err (!%p2413_p8)
}
 0xae1   : > { %s2417_s13 = scalar_lea.hbm %s1709_s30, 128  ;;  %s2421_s3 = scalar_lea.hbm %s3158_s11, 256 }
 0xae2   : > { %p2418_p0 = scmp.ne.s32.totalorder %s1709_s30, %s2417_s13  ;;  %p2422_p3 = scmp.lt.s32.totalorder %s1709_s30, %s3158_s11 }
 0xae3   : > { %p2423_p4 = scmp.lt.s32.totalorder %s2421_s3, %s2417_s13 }
 0xae4   : > { %p2419_p5 = pnand %p2418_p0, %p2728_p12 }
 0xae5   : > { %p2424_p1 = por %p2423_p4, %p2422_p3 }
 0xae6   : > { %p2420_p13 = pneg %p2419_p5 }
 0xae8   : > { %p2425_p2 = pnand %p2424_p1, %p2420_p13 }
 0xaea   : > { %2428 = shalt.err (!%p2425_p2)
}
 0xaeb   : > { %2151 = dma.vmem_to_hbm [thread:$0]  (%p2728_p12), %s1712_s24, 128, %s1709_s30, %s1698_s2  }
 0xaec PF: > { %s3159_s14 = sld [smem:[#allocation24_spill]] }
 0xaed   : > { %s3160_s29 = sld [smem:[#allocation18_spill]] }
 0xaf2   : > { %p2176_p11 = scmp.ge.s32.totalorder %s3159_s14, 2 }
 0xaf3   : > { %s1723_s20 = sand.u32 1, %s3160_s29  }
 0xaf4   : > { %p2168_p7 = pnand %p2176_p11, %p2678_p6  ;;  %s1724_s1 = scalar_lea.sflag [#allocation6], %s1723_s20 }
 0xaf6   : > { %p2169_p9 = pneg %p2168_p7 }
 0xaf8   : > { %2478 = dma.done.wait (%p2169_p9), %s1724_s1, 128  }
 0xaf9   : > { %2480 = vsyncadd (%p2169_p9), %s1724_s1, 4294967168  ;;  %s36_s28 = sadd.s32 1, %s3159_s14   ;;  %s3162_s21 = sld [smem:[#allocation19_spill]] }
 0xafa   : > { %p33_p10 = scmp.ge.s32.totalorder %s36_s28, 6   ;;  %s3163_s22 = sld [smem:[#allocation20_spill]] }
 0xafb   : > { %s3164_s23 = sld [smem:[#allocation29_spill]] }
 0xafc   : > { %s3165_s24 = sld [smem:[#allocation22_spill]]  ;;  %35 = sbr.rel (!%p33_p10) target bundleno = 25 (0x19), region = 190 }
 0xafd   : > { %s3166_s25 = sld [smem:[#allocation23_spill]] }
 0xafe   : > { %s3167_s26 = sld [smem:[#allocation26_spill]] }
 0xaff   : > { %s3168_s27 = sld [smem:[#allocation28_spill]] }
 0xb01   :  { %1729 = vsyncpa [#allocation5], 1 }
 0xb02   :  { %1731 = vsyncpa [#allocation5 + $0x1], 1 }
 0xb03   :  { %1732 = vsyncpa [#allocation8], 1 }
 0xb04   :  { %1734 = vsyncpa [#allocation8 + $0x1], 1 }
 0xb05   :  { %1735 = vsyncpa [#allocation11], 1 }
 0xb06   :  { %1736 = vsyncpa [#allocation6], 1 }
 0xb07   :  { %1738 = vsyncpa [#allocation6 + $0x1], 1 }

</bundles_post_ra>
